<compile_context>
chip_gen: v7x
topology: tpu7x:2x2x1
jax: 0.10.0
libtpu: 0.0.40
codegen_flags: <defaults>
</compile_context>

<pallas_src>
import functools

import jax
import jax.numpy as jnp
from jax.experimental import pallas as pl
from jax.experimental.pallas import tpu as pltpu


_VMEM_SPEC = pl.BlockSpec(memory_space=pltpu.MemorySpace.VMEM)
_SMEM_SPEC = pl.BlockSpec(memory_space=pltpu.MemorySpace.SMEM)


# ----------------------------- Pallas kernels -----------------------------

def _conv1_kernel(p_ref, w_ref, b_ref, o_ref):
    """conv1 as im2col GEMM: o = relu(p @ w + b).  p/w bf16, epilogue f32."""
    acc = jnp.dot(p_ref[...], w_ref[...], preferred_element_type=jnp.float32)
    o_ref[...] = jnp.maximum(acc + b_ref[...], 0.0).astype(o_ref.dtype)


def _fused_tail_kernel(p2_ref, w2_ref, b2_ref, fw_ref, fb_ref, wh_ref, bh_ref,
                       r_ref, out_ref, h_acc, *, batch, chunk_sp, out_ch):
    """conv2 GEMM + fc (K-chunked) + both heads, fused; fw streamed per step.

    The grid axis ("arbitrary") walks the fc contraction dimension in chunks
    of chunk_sp spatial positions (= chunk_sp*C2 fc-input features).

    p2_ref : (1, batch*chunk_sp, 64*16) bf16   conv2 patches, rows (b, q)
    w2_ref : (64*16, C2)                bf16   conv2 weight in GEMM layout
    fw_ref : (chunk_sp*C2, 1024)        bf16   fc-weight K-chunk, rows (q, c)
    wh_ref : (1024, HN)                 bf16   [mu_w | k_w | zero-pad] lane-dense
    out_ref: (batch, HN)                f32    cols [0,out_ch)=normalized mu,
                                               col out_ch = softplus(k)+r
    h_acc  : (batch, 1024)              f32    fc accumulator (VMEM scratch)
    """
    k = pl.program_id(0)

    @pl.when(k == 0)
    def _():
        h_acc[...] = jnp.zeros_like(h_acc)

    # ---- conv2 (Conv2d(64, C2, 4, s=2, p=1) + ReLU) for this chunk ----
    c2 = jnp.dot(p2_ref[0], w2_ref[...], preferred_element_type=jnp.float32)
    c2 = jnp.maximum(c2 + b2_ref[...], 0.0)           # (batch*chunk_sp, C2) f32
    # Rows are (b, q); flatten to (batch, chunk_sp*C2) so columns line up with
    # this step's fw rows (q, c).  Replaces the old 16-way M=2 fc loop.
    c2 = c2.reshape(batch, chunk_sp * c2.shape[-1]).astype(jnp.bfloat16)

    # ---- fc partial: one K-chunk GEMM, f32 accumulation in scratch ----
    h_acc[...] += jnp.dot(c2, fw_ref[...], preferred_element_type=jnp.float32)

    # ---- heads epilogue only on the last chunk ----
    @pl.when(k == pl.num_programs(0) - 1)
    def _():
        h = jnp.maximum(h_acc[...] + fb_ref[...], 0.0).astype(jnp.bfloat16)
        raw = jnp.dot(h, wh_ref[...], preferred_element_type=jnp.float32)
        raw = raw + bh_ref[...]                        # (batch, HN) f32
        col = jax.lax.broadcasted_iota(jnp.int32, raw.shape, 1)
        mu_mask = col < out_ch
        # L2 normalize mu (rsqrt -> EUP; eps keeps parity with F.normalize).
        ssum = jnp.sum(jnp.where(mu_mask, raw * raw, 0.0), axis=-1, keepdims=True)
        inv = jax.lax.rsqrt(ssum + 1e-12)
        # Numerically stable softplus; r comes from SMEM (runtime scalar).
        # HN=128 == one vreg, so restricting this to the single k column would
        # not reduce EUP work.
        sp = jnp.maximum(raw, 0.0) + jnp.log1p(jnp.exp(-jnp.abs(raw))) + r_ref[0]
        out = jnp.where(mu_mask, raw * inv, jnp.where(col == out_ch, sp, 0.0))
        out_ref[...] = out.astype(out_ref.dtype)


# ------------------------------- JAX glue ---------------------------------

def im2col_nhwc(x_nhwc, k, s, p):
    """Conv patch extraction (XLA glue).  Rows (b, i, j); cols (C, kh, kw),
    matching a flattened PyTorch conv weight (Cout, Cin, kh, kw)."""
    B, H, W, C = x_nhwc.shape
    xp = jnp.pad(x_nhwc, ((0, 0), (p, p), (p, p), (0, 0)))
    Ho = (H + 2 * p - k) // s + 1
    Wo = (W + 2 * p - k) // s + 1
    pats = []
    for di in range(k):
        for dj in range(k):
            pats.append(xp[:, di:di + s * Ho:s, dj:dj + s * Wo:s, :])  # (B,Ho,Wo,C)
    pt = jnp.stack(pats, axis=0).reshape(k, k, B, Ho, Wo, C)
    pt = pt.transpose(2, 3, 4, 5, 0, 1)            # (B, Ho, Wo, C, kh, kw)
    return pt.reshape(B * Ho * Wo, C * k * k), Ho, Wo


def _pick_n_chunks(hw2, batch):
    """fc K-chunk count: divides hw2, keeps batch*chunk_sp sublane-aligned."""
    for n in (4, 2):
        if hw2 % n == 0 and (batch * (hw2 // n)) % 8 == 0:
            return n
    return 1


def init_params(key, input_channels, output_channels, cshape):
    """Deterministic synthetic init (shapes match the PyTorch module).

    Returns (params, raw): `raw` keeps PyTorch layouts (f32) for the reference
    check; `params` holds the kernel-ready layouts (bf16 where appropriate).
    """
    C2, H2, W2 = int(cshape[0]), int(cshape[1]), int(cshape[2])
    iels = C2 * H2 * W2
    hw2 = H2 * W2
    ks = jax.random.split(key, 10)

    def nrm(k_, shape, scale=0.02):
        return scale * jax.random.normal(k_, shape, jnp.float32)

    raw = dict(
        conv1_w=nrm(ks[0], (64, input_channels, 4, 4)),
        conv1_b=nrm(ks[1], (64,)),
        conv2_w=nrm(ks[2], (C2, 64, 4, 4)),
        conv2_b=nrm(ks[3], (C2,)),
        fc_w=nrm(ks[4], (1024, iels)),
        fc_b=nrm(ks[5], (1024,)),
        mu_w=nrm(ks[6], (output_channels, 1024)),
        mu_b=nrm(ks[7], (output_channels,)),
        k_w=nrm(ks[8], (1, 1024)),
        k_b=nrm(ks[9], (1,)),
    )

    # Lane-dense combined head weight/bias: [mu | k | zero padding] -> width HN.
    HN = 128 * pl.cdiv(output_channels + 1, 128)
    wh = jnp.zeros((1024, HN), jnp.float32)
    wh = wh.at[:, :output_channels].set(raw["mu_w"].T)
    wh = wh.at[:, output_channels].set(raw["k_w"][0])
    bh = jnp.zeros((HN,), jnp.float32)
    bh = bh.at[:output_channels].set(raw["mu_b"])
    bh = bh.at[output_channels].set(raw["k_b"][0])

    params = dict(
        w1=raw["conv1_w"].reshape(64, -1).T.astype(jnp.bfloat16),   # (Cin*16, 64)
        b1=raw["conv1_b"].reshape(1, -1),
        w2=raw["conv2_w"].reshape(C2, -1).T.astype(jnp.bfloat16),   # (64*16, C2)
        b2=raw["conv2_b"].reshape(1, -1),
        # fc weight rows permuted ONCE so the (b, spatial, channel) flatten of
        # the NHWC conv2 output matches torch's NCHW flatten, then flattened to
        # 2-D (hw2*C2, 1024) so the kernel runs a single K GEMM per chunk.
        fw=raw["fc_w"].reshape(1024, C2, hw2).transpose(2, 1, 0)
            .reshape(hw2 * C2, 1024).astype(jnp.bfloat16),
        fb=raw["fc_b"].reshape(1, -1),
        wh=wh.astype(jnp.bfloat16),                                 # (1024, HN)
        bh=bh.reshape(1, -1),
    )
    return params, raw


def encoder_forward(params, x_nchw, r, *, output_channels):
    B = x_nchw.shape[0]
    x_nhwc = jnp.transpose(x_nchw, (0, 2, 3, 1))

    # conv1 (Conv2d(Cin, 64, 4, s=2, p=1) + ReLU) as an im2col GEMM (bf16 MXU).
    p1, H1, W1 = im2col_nhwc(x_nhwc, 4, 2, 1)
    n64 = params["w1"].shape[1]
    c1 = pl.pallas_call(
        _conv1_kernel,
        out_shape=jax.ShapeDtypeStruct((p1.shape[0], n64), jnp.float32),
        in_specs=[_VMEM_SPEC, _VMEM_SPEC, _VMEM_SPEC],
        out_specs=_VMEM_SPEC,
    )(p1.astype(jnp.bfloat16), params["w1"], params["b1"])
    c1_nhwc = c1.reshape(B, H1, W1, n64)          # stays NHWC, no transpose

    # conv2 im2col patches (XLA glue), rows (b, i2, j2); regrouped into fc
    # K-chunks so the fused kernel streams the 4 MiB fc weight chunk-by-chunk
    # (double-buffered) while the MXU works on the previous chunk.
    p2, H2, W2 = im2col_nhwc(c1_nhwc, 4, 2, 1)
    hw2 = H2 * W2
    K2 = p2.shape[1]
    n_chunks = _pick_n_chunks(hw2, B)
    chunk_sp = hw2 // n_chunks
    p2r = (p2.reshape(B, n_chunks, chunk_sp, K2)
             .transpose(1, 0, 2, 3)
             .reshape(n_chunks, B * chunk_sp, K2)
             .astype(jnp.bfloat16))

    C2 = params["w2"].shape[1]
    HN = params["wh"].shape[1]
    r_arr = jnp.reshape(jnp.asarray(r, jnp.float32), (1,))

    heads = pl.pallas_call(
        functools.partial(_fused_tail_kernel, batch=B, chunk_sp=chunk_sp,
                          out_ch=output_channels),
        out_shape=jax.ShapeDtypeStruct((B, HN), jnp.float32),
        grid=(n_chunks,),
        in_specs=[
            pl.BlockSpec((1, B * chunk_sp, K2), lambda k: (k, 0, 0)),   # p2 chunk
            pl.BlockSpec((K2, C2), lambda k: (0, 0)),                   # w2 (resident)
            pl.BlockSpec((1, C2), lambda k: (0, 0)),                    # b2
            pl.BlockSpec((chunk_sp * C2, 1024), lambda k: (k, 0)),      # fw K-chunk
            pl.BlockSpec((1, 1024), lambda k: (0, 0)),                  # fb
            pl.BlockSpec((1024, HN), lambda k: (0, 0)),                 # head weight
            pl.BlockSpec((1, HN), lambda k: (0, 0)),                    # head bias
            _SMEM_SPEC,                                                 # r scalar
        ],
        out_specs=pl.BlockSpec((B, HN), lambda k: (0, 0)),
        scratch_shapes=[pltpu.VMEM((B, 1024), jnp.float32)],
        compiler_params=pltpu.CompilerParams(
            dimension_semantics=("arbitrary",),
            # ~2.7 MiB live; 32 MiB scoped limit is safe on v5e/v6e/v7x alike.
            vmem_limit_bytes=32 * 1024 * 1024),
    )(p2r, params["w2"], params["b2"], params["fw"], params["fb"],
      params["wh"], params["bh"], r_arr)

    mu = heads[:, :output_channels]
    k = heads[:, output_channels:output_channels + 1]
    # TODO(synk): VonMisesFisher(mu, k).rsample() uses data-dependent rejection
    # sampling (Wood's algorithm) with no clean Pallas equivalent; return the
    # vMF mode (normalized mu) as z.
    z = mu
    return z, mu, k


def reference_forward(raw, x_nchw, r, output_channels):
    """Pure-jnp reference in torch layouts (bf16 cast at the same GEMMs)."""
    bf = jnp.bfloat16
    B = x_nchw.shape[0]
    x_nhwc = jnp.transpose(x_nchw, (0, 2, 3, 1))
    p1, H1, W1 = im2col_nhwc(x_nhwc, 4, 2, 1)
    w1 = raw["conv1_w"].reshape(64, -1).T
    c1 = jnp.maximum(
        jnp.dot(p1.astype(bf), w1.astype(bf), preferred_element_type=jnp.float32)
        + raw["conv1_b"], 0.0)
    c1_nhwc = c1.reshape(B, H1, W1, 64)
    p2, H2, W2 = im2col_nhwc(c1_nhwc, 4, 2, 1)
    w2 = raw["conv2_w"].reshape(raw["conv2_w"].shape[0], -1).T
    c2 = jnp.maximum(
        jnp.dot(p2.astype(bf), w2.astype(bf), preferred_element_type=jnp.float32)
        + raw["conv2_b"], 0.0)
    c2_nchw = c2.reshape(B, H2, W2, -1).transpose(0, 3, 1, 2)
    flat = c2_nchw.reshape(B, -1)
    h = jnp.maximum(
        jnp.dot(flat.astype(bf), raw["fc_w"].T.astype(bf),
                preferred_element_type=jnp.float32) + raw["fc_b"], 0.0)
    mu_raw = jnp.dot(h.astype(bf), raw["mu_w"].T.astype(bf),
                     preferred_element_type=jnp.float32) + raw["mu_b"]
    k_raw = jnp.dot(h.astype(bf), raw["k_w"].T.astype(bf),
                    preferred_element_type=jnp.float32) + raw["k_b"]
    k = jnp.maximum(k_raw, 0.0) + jnp.log1p(jnp.exp(-jnp.abs(k_raw))) + r
    mu = mu_raw * jax.lax.rsqrt(jnp.sum(mu_raw * mu_raw, axis=-1, keepdims=True)
                                + 1e-12)
    return mu, k


# --------------------------------- main ------------------------------------

if __name__ == "__main__":
    # Small configuration consistent with the module:
    #   16x16 input -> conv(s2) -> 8x8 -> conv(s2) -> 4x4, cshape=(128,4,4)
    B, Cin, H, W = 2, 1, 16, 16
    OC = 32
    cshape = (128, 4, 4)
    r = 80.0

    key = jax.random.PRNGKey(0)
    pkey, xkey = jax.random.split(key)
    params, raw = init_params(pkey, Cin, OC, cshape)
    x = jax.random.normal(xkey, (B, Cin, H, W), jnp.float32)

    fwd = jax.jit(functools.partial(encoder_forward, output_channels=OC))
    z, mu, k = fwd(params, x, jnp.float32(r))
    jax.block_until_ready((z, mu, k))

    assert z.shape == (B, OC) and mu.shape == (B, OC) and k.shape == (B, 1)
    # mu rows are unit-norm; k = softplus(.) + r >= r
    assert bool(jnp.allclose(jnp.linalg.norm(mu, axis=1), 1.0, atol=1e-3))
    assert bool(jnp.all(k >= r))

    # Check against a pure-jnp reference built from the torch-layout weights
    # (validates the fc-row permutation, K-chunking and head packing).
    mu_ref, k_ref = reference_forward(raw, x, r, OC)
    assert bool(jnp.allclose(mu, mu_ref, atol=2e-2, rtol=2e-2))
    assert bool(jnp.allclose(k, k_ref, atol=2e-2, rtol=2e-2))

    print("KERNEL_OK")
</pallas_src>

<mosaic_0001>
module attributes {stable_mosaic.version = 11 : i64} {
  func.func @_conv1_kernel(%arg0: memref<128x16xbf16, #tpu.memory_space<vmem>>, %arg1: memref<16x64xbf16, #tpu.memory_space<vmem>>, %arg2: memref<1x64xf32, #tpu.memory_space<vmem>>, %arg3: memref<128x64xf32, #tpu.memory_space<vmem>>) attributes {dimension_semantics = [], scalar_prefetch = 0 : i64, scratch_operands = 0 : i64, tpu.core_type = #tpu.core_type<tc>} {
    %c0 = arith.constant 0 : index
    %c0_0 = arith.constant 0 : index
    %0 = vector.load %arg0[%c0, %c0_0] : memref<128x16xbf16, #tpu.memory_space<vmem>>, vector<128x16xbf16>
    %c0_1 = arith.constant 0 : index
    %c0_2 = arith.constant 0 : index
    %1 = vector.load %arg1[%c0_1, %c0_2] : memref<16x64xbf16, #tpu.memory_space<vmem>>, vector<16x64xbf16>
    %cst = arith.constant dense<0.000000e+00> : vector<128x64xf32>
    %2 = tpu.matmul %0, %1, %cst {dimension_numbers = #tpu.dot_dimension_numbers<[1], [0], [0], [1], [0, 0, 1, 1], [], []>} : vector<128x16xbf16>, vector<16x64xbf16>, vector<128x64xf32> -> vector<128x64xf32>
    %c0_3 = arith.constant 0 : index
    %c0_4 = arith.constant 0 : index
    %3 = vector.load %arg2[%c0_3, %c0_4] : memref<1x64xf32, #tpu.memory_space<vmem>>, vector<1x64xf32>
    %4 = vector.broadcast %3 : vector<1x64xf32> to vector<128x64xf32>
    %5 = arith.addf %2, %4 : vector<128x64xf32>
    %cst_5 = arith.constant 0.000000e+00 : f32
    %6 = vector.broadcast %cst_5 : f32 to vector<128x64xf32>
    %7 = arith.maximumf %5, %6 : vector<128x64xf32>
    %c0_6 = arith.constant 0 : index
    %c0_7 = arith.constant 0 : index
    %8 = vector.load %arg3[%c0_6, %c0_7] : memref<128x64xf32, #tpu.memory_space<vmem>>, vector<128x64xf32>
    tpu.vector_store %arg3[%c0_6, %c0_7], %7 {strides = array<i32>} : memref<128x64xf32, #tpu.memory_space<vmem>>, vector<128x64xf32>,
    return
  }
}

module attributes {stable_mosaic.version = 11 : i64} {
  func.func @_fused_tail_kernel(%arg0: i32, %arg1: memref<1x8x1024xbf16, #tpu.memory_space<vmem>>, %arg2: memref<1024x128xbf16, #tpu.memory_space<vmem>>, %arg3: memref<1x128xf32, #tpu.memory_space<vmem>>, %arg4: memref<512x1024xbf16, #tpu.memory_space<vmem>>, %arg5: memref<1x1024xf32, #tpu.memory_space<vmem>>, %arg6: memref<1024x128xbf16, #tpu.memory_space<vmem>>, %arg7: memref<1x128xf32, #tpu.memory_space<vmem>>, %arg8: memref<1xf32, #tpu.memory_space<smem>>, %arg9: memref<2x128xf32, #tpu.memory_space<vmem>>, %arg10: memref<2x1024xf32, #tpu.memory_space<vmem>>) attributes {dimension_semantics = [#tpu.dimension_semantics<arbitrary>], iteration_bounds = array<i64: 4>, scalar_prefetch = 0 : i64, scratch_operands = 1 : i64, tpu.core_type = #tpu.core_type<tc>, window_params = [{transform_indices = @transform_0, window_bounds = array<i64: 1, 8, 1024>}, {pipeline_mode = #tpu.pipeline_mode<synchronous>, transform_indices = @transform_1, window_bounds = array<i64: 1024, 128>}, {pipeline_mode = #tpu.pipeline_mode<synchronous>, transform_indices = @transform_2, window_bounds = array<i64: 1, 128>}, {transform_indices = @transform_3, window_bounds = array<i64: 512, 1024>}, {pipeline_mode = #tpu.pipeline_mode<synchronous>, transform_indices = @transform_4, window_bounds = array<i64: 1, 1024>}, {pipeline_mode = #tpu.pipeline_mode<synchronous>, transform_indices = @transform_5, window_bounds = array<i64: 1024, 128>}, {pipeline_mode = #tpu.pipeline_mode<synchronous>, transform_indices = @transform_6, window_bounds = array<i64: 1, 128>}, {transform_indices = @transform_7, window_bounds = array<i64: 1>}, {pipeline_mode = #tpu.pipeline_mode<synchronous>, transform_indices = @transform_8, window_bounds = array<i64: 2, 128>}]} {
    %c0_i32 = arith.constant 0 : i32
    %0 = arith.cmpi eq, %arg0, %c0_i32 : i32
    %1 = arith.extui %0 : i1 to i32
    %c0_i32_0 = arith.constant 0 : i32
    %2 = arith.cmpi ne, %1, %c0_i32_0 : i32
    scf.if %2 {
      %cst_16 = arith.constant 0.000000e+00 : f32
      %22 = vector.broadcast %cst_16 : f32 to vector<2x1024xf32>
      %c0_17 = arith.constant 0 : index
      %c0_18 = arith.constant 0 : index
      %23 = vector.load %arg10[%c0_17, %c0_18] : memref<2x1024xf32, #tpu.memory_space<vmem>>, vector<2x1024xf32>
      tpu.vector_store %arg10[%c0_17, %c0_18], %22 {strides = array<i32>} : memref<2x1024xf32, #tpu.memory_space<vmem>>, vector<2x1024xf32>,
    } else {
    }
    %c0 = arith.constant 0 : index
    %c0_1 = arith.constant 0 : index
    %c0_2 = arith.constant 0 : index
    %3 = vector.load %arg1[%c0, %c0_1, %c0_2] : memref<1x8x1024xbf16, #tpu.memory_space<vmem>>, vector<1x8x1024xbf16>
    %4 = vector.shape_cast %3 : vector<1x8x1024xbf16> to vector<8x1024xbf16>
    %c0_3 = arith.constant 0 : index
    %c0_4 = arith.constant 0 : index
    %5 = vector.load %arg2[%c0_3, %c0_4] : memref<1024x128xbf16, #tpu.memory_space<vmem>>, vector<1024x128xbf16>
    %cst = arith.constant dense<0.000000e+00> : vector<8x128xf32>
    %6 = tpu.matmul %4, %5, %cst {dimension_numbers = #tpu.dot_dimension_numbers<[1], [0], [0], [1], [0, 0, 1, 1], [], []>} : vector<8x1024xbf16>, vector<1024x128xbf16>, vector<8x128xf32> -> vector<8x128xf32>
    %c0_5 = arith.constant 0 : index
    %c0_6 = arith.constant 0 : index
    %7 = vector.load %arg3[%c0_5, %c0_6] : memref<1x128xf32, #tpu.memory_space<vmem>>, vector<1x128xf32>
    %8 = vector.broadcast %7 : vector<1x128xf32> to vector<8x128xf32>
    %9 = arith.addf %6, %8 : vector<8x128xf32>
    %cst_7 = arith.constant 0.000000e+00 : f32
    %10 = vector.broadcast %cst_7 : f32 to vector<8x128xf32>
    %11 = arith.maximumf %9, %10 : vector<8x128xf32>
    %12 = vector.shape_cast %11 : vector<8x128xf32> to vector<2x512xf32>
    %13 = arith.truncf %12 : vector<2x512xf32> to vector<2x512xbf16>
    %c0_8 = arith.constant 0 : index
    %c0_9 = arith.constant 0 : index
    %14 = vector.load %arg10[%c0_8, %c0_9] : memref<2x1024xf32, #tpu.memory_space<vmem>>, vector<2x1024xf32>
    %c0_10 = arith.constant 0 : index
    %c0_11 = arith.constant 0 : index
    %15 = vector.load %arg4[%c0_10, %c0_11] : memref<512x1024xbf16, #tpu.memory_space<vmem>>, vector<512x1024xbf16>
    %cst_12 = arith.constant dense<0.000000e+00> : vector<2x1024xf32>
    %16 = tpu.matmul %13, %15, %cst_12 {dimension_numbers = #tpu.dot_dimension_numbers<[1], [0], [0], [1], [0, 0, 1, 1], [], []>} : vector<2x512xbf16>, vector<512x1024xbf16>, vector<2x1024xf32> -> vector<2x1024xf32>
    %17 = arith.addf %14, %16 : vector<2x1024xf32>
    %c0_13 = arith.constant 0 : index
    %c0_14 = arith.constant 0 : index
    %18 = vector.load %arg10[%c0_13, %c0_14] : memref<2x1024xf32, #tpu.memory_space<vmem>>, vector<2x1024xf32>
    tpu.vector_store %arg10[%c0_13, %c0_14], %17 {strides = array<i32>} : memref<2x1024xf32, #tpu.memory_space<vmem>>, vector<2x1024xf32>,
    %c3_i32 = arith.constant 3 : i32
    %19 = arith.cmpi eq, %arg0, %c3_i32 : i32
    %20 = arith.extui %19 : i1 to i32
    %c0_i32_15 = arith.constant 0 : i32
    %21 = arith.cmpi ne, %20, %c0_i32_15 : i32
    scf.if %21 {
      %c0_16 = arith.constant 0 : index
      %c0_17 = arith.constant 0 : index
      %22 = vector.load %arg10[%c0_16, %c0_17] : memref<2x1024xf32, #tpu.memory_space<vmem>>, vector<2x1024xf32>
      %c0_18 = arith.constant 0 : index
      %c0_19 = arith.constant 0 : index
      %23 = vector.load %arg5[%c0_18, %c0_19] : memref<1x1024xf32, #tpu.memory_space<vmem>>, vector<1x1024xf32>
      %24 = vector.broadcast %23 : vector<1x1024xf32> to vector<2x1024xf32>
      %25 = arith.addf %22, %24 : vector<2x1024xf32>
      %cst_20 = arith.constant 0.000000e+00 : f32
      %26 = vector.broadcast %cst_20 : f32 to vector<2x1024xf32>
      %27 = arith.maximumf %25, %26 : vector<2x1024xf32>
      %28 = arith.truncf %27 : vector<2x1024xf32> to vector<2x1024xbf16>
      %c0_21 = arith.constant 0 : index
      %c0_22 = arith.constant 0 : index
      %29 = vector.load %arg6[%c0_21, %c0_22] : memref<1024x128xbf16, #tpu.memory_space<vmem>>, vector<1024x128xbf16>
      %cst_23 = arith.constant dense<0.000000e+00> : vector<2x128xf32>
      %30 = tpu.matmul %28, %29, %cst_23 {dimension_numbers = #tpu.dot_dimension_numbers<[1], [0], [0], [1], [0, 0, 1, 1], [], []>} : vector<2x1024xbf16>, vector<1024x128xbf16>, vector<2x128xf32> -> vector<2x128xf32>
      %c0_24 = arith.constant 0 : index
      %c0_25 = arith.constant 0 : index
      %31 = vector.load %arg7[%c0_24, %c0_25] : memref<1x128xf32, #tpu.memory_space<vmem>>, vector<1x128xf32>
      %32 = vector.broadcast %31 : vector<1x128xf32> to vector<2x128xf32>
      %33 = arith.addf %30, %32 : vector<2x128xf32>
      %34 = tpu.iota {dimensions = array<i32: 1>} : vector<2x128xi32>
      %c32_i32 = arith.constant 32 : i32
      %35 = vector.broadcast %c32_i32 : i32 to vector<2x128xi32>
      %36 = arith.cmpi slt, %34, %35 : vector<2x128xi32>
      %37 = arith.mulf %33, %33 : vector<2x128xf32>
      %cst_26 = arith.constant 0.000000e+00 : f32
      %38 = vector.broadcast %cst_26 : f32 to vector<2x128xf32>
      %39 = arith.select %36, %37, %38 : vector<2x128xi1>, vector<2x128xf32>
      %cst_27 = arith.constant dense<0.000000e+00> : vector<2xf32>
      %40 = vector.multi_reduction <add>, %39, %cst_27 [1] : vector<2x128xf32> to vector<2xf32>
      %41 = vector.shape_cast %40 : vector<2xf32> to vector<2x1xf32>
      %cst_28 = arith.constant 9.99999996E-13 : f32
      %42 = vector.broadcast %cst_28 : f32 to vector<2x1xf32>
      %43 = arith.addf %41, %42 : vector<2x1xf32>
      %44 = math.rsqrt %43 : vector<2x1xf32>
      %cst_29 = arith.constant 0.000000e+00 : f32
      %45 = vector.broadcast %cst_29 : f32 to vector<2x128xf32>
      %46 = arith.maximumf %33, %45 : vector<2x128xf32>
      %47 = math.absf %33 : vector<2x128xf32>
      %cst_30 = arith.constant 0.000000e+00 : f32
      %48 = vector.broadcast %cst_30 : f32 to vector<2x128xf32>
      %49 = arith.subf %48, %47 : vector<2x128xf32>
      %50 = math.exp %49 : vector<2x128xf32>
      %51 = math.log1p %50 : vector<2x128xf32>
      %52 = arith.addf %46, %51 : vector<2x128xf32>
      %c0_31 = arith.constant 0 : index
      %53 = memref.load %arg8[%c0_31] : memref<1xf32, #tpu.memory_space<smem>>
      %54 = vector.broadcast %53 : f32 to vector<2x128xf32>
      %55 = arith.addf %52, %54 : vector<2x128xf32>
      %56 = vector.broadcast %44 : vector<2x1xf32> to vector<2x128xf32>
      %57 = arith.mulf %33, %56 : vector<2x128xf32>
      %c32_i32_32 = arith.constant 32 : i32
      %58 = vector.broadcast %c32_i32_32 : i32 to vector<2x128xi32>
      %59 = arith.cmpi eq, %34, %58 : vector<2x128xi32>
      %cst_33 = arith.constant 0.000000e+00 : f32
      %60 = vector.broadcast %cst_33 : f32 to vector<2x128xf32>
      %61 = arith.select %59, %55, %60 : vector<2x128xi1>, vector<2x128xf32>
      %62 = arith.select %36, %57, %61 : vector<2x128xi1>, vector<2x128xf32>
      %c0_34 = arith.constant 0 : index
      %c0_35 = arith.constant 0 : index
      %63 = vector.load %arg9[%c0_34, %c0_35] : memref<2x128xf32, #tpu.memory_space<vmem>>, vector<2x128xf32>
      tpu.vector_store %arg9[%c0_34, %c0_35], %62 {strides = array<i32>} : memref<2x128xf32, #tpu.memory_space<vmem>>, vector<2x128xf32>,
    } else {
    }
    return
  }
  func.func @transform_0(%arg0: i32) -> (i32, i32, i32) {
    %c0_i32 = arith.constant 0 : i32
    %c0_i32_0 = arith.constant 0 : i32
    %c0_i32_1 = arith.constant 0 : i32
    return %arg0, %c0_i32, %c0_i32_0 : i32, i32, i32
  }
  func.func @transform_1(%arg0: i32) -> (i32, i32) {
    %c0_i32 = arith.constant 0 : i32
    %c0_i32_0 = arith.constant 0 : i32
    %c0_i32_1 = arith.constant 0 : i32
    return %c0_i32, %c0_i32_0 : i32, i32
  }
  func.func @transform_2(%arg0: i32) -> (i32, i32) {
    %c0_i32 = arith.constant 0 : i32
    %c0_i32_0 = arith.constant 0 : i32
    %c0_i32_1 = arith.constant 0 : i32
    return %c0_i32, %c0_i32_0 : i32, i32
  }
  func.func @transform_3(%arg0: i32) -> (i32, i32) {
    %c0_i32 = arith.constant 0 : i32
    %c0_i32_0 = arith.constant 0 : i32
    return %arg0, %c0_i32 : i32, i32
  }
  func.func @transform_4(%arg0: i32) -> (i32, i32) {
    %c0_i32 = arith.constant 0 : i32
    %c0_i32_0 = arith.constant 0 : i32
    %c0_i32_1 = arith.constant 0 : i32
    return %c0_i32, %c0_i32_0 : i32, i32
  }
  func.func @transform_5(%arg0: i32) -> (i32, i32) {
    %c0_i32 = arith.constant 0 : i32
    %c0_i32_0 = arith.constant 0 : i32
    %c0_i32_1 = arith.constant 0 : i32
    return %c0_i32, %c0_i32_0 : i32, i32
  }
  func.func @transform_6(%arg0: i32) -> (i32, i32) {
    %c0_i32 = arith.constant 0 : i32
    %c0_i32_0 = arith.constant 0 : i32
    %c0_i32_1 = arith.constant 0 : i32
    return %c0_i32, %c0_i32_0 : i32, i32
  }
  func.func @transform_7(%arg0: i32) -> i32 {
    %c0_i32 = arith.constant 0 : i32
    %c0_i32_0 = arith.constant 0 : i32
    return %c0_i32 : i32
  }
  func.func @transform_8(%arg0: i32) -> (i32, i32) {
    %c0_i32 = arith.constant 0 : i32
    %c0_i32_0 = arith.constant 0 : i32
    %c0_i32_1 = arith.constant 0 : i32
    return %c0_i32, %c0_i32_0 : i32, i32
  }
}

</mosaic_0001>

<bundles_post_ra>
// kernel: encoder_forward.2
= control target key start
LH: loop header
LB: loop body
LE: loop exit
PB: predicated region body
PF: predicated region fallthrough
CT: control target
= control target key end

     0   :  { %8 = vsyncpa [#allocation3], 0  ;;  %s525_s0 = inlined_call_operand.vmem [shape: bf16[128,16], index: 0, kind: input, shape index: {}]   ;;  %s526_s1 = inlined_call_operand.hbm [shape: bf16[16,64], index: 1, kind: input, shape index: {}]   ;;  %s527_s2 = inlined_call_operand.hbm [shape: f32[1,64], index: 2, kind: input, shape index: {}]   ;;  %s528_s3 = inlined_call_operand.vmem [shape: f32[128,64], index: 3, kind: output, shape index: {}]  }
   0x1   :  { %9 = vsyncpa [#allocation5], 0  ;;  %s381_s12 = smov [#allocation2]   ;;  %s333_s16 = scalar_lea.hbm %s526_s1, 128 }
   0x2   :  { %s17_s13 = sshll.u32 %s381_s12, 4  ;;  %p334_p0 = scmp.ne.s32.totalorder %s526_s1, %s333_s16  ;;  %s18_s13 = int_to_ptr.vmem [resolvable:$true] %s17_s13 }
   0x3   :  { %p337_p1 = scmp.lt.u32.totalorder %s333_s16, %s526_s1 }
   0x5   :  { %p339_p2 = pnand %p337_p1, %p334_p0 }
   0x7   :  { %342 = shalt.err (!%p339_p2)
}
   0x8   :  { %s343_s21 = scalar_lea.vmem %s18_s13, 128  ;;  %p348_p4 = scmp.lt.s32.totalorder %s18_s13, %s18_s13 }
   0x9   :  { %p344_p3 = scmp.ne.s32.totalorder %s18_s13, %s343_s21  ;;  %p349_p5 = scmp.lt.s32.totalorder %s343_s21, %s343_s21 }
   0xb   :  { %p350_p6 = por %p349_p5, %p348_p4 }
   0xd   :  { %p351_p7 = pnand %p350_p6, %p344_p3 }
   0xf   :  { %354 = shalt.err (!%p351_p7)
}
  0x10   :  { %s382_s22 = smov 64   ;;  %s383_s23 = smov 4  }
  0x11   :  { %23 = dma.hbm_to_vmem [thread:$0]  %s526_s1, 128, %s18_s13, [#allocation3], %s382_s22, %s382_s22, %s383_s23  }
  0x12   :  { %s384_s26 = smov [#allocation4]   ;;  %s355_s30 = scalar_lea.hbm %s527_s2, 16 }
  0x13   :  { %s30_s27 = sshll.u32 %s384_s26, 4  ;;  %p356_p8 = scmp.ne.s32.totalorder %s527_s2, %s355_s30  ;;  %s31_s27 = int_to_ptr.vmem [resolvable:$true] %s30_s27 }
  0x14   :  { %p359_p9 = scmp.lt.u32.totalorder %s355_s30, %s527_s2 }
  0x16   :  { %p361_p10 = pnand %p359_p9, %p356_p8 }
  0x18   :  { %364 = shalt.err (!%p361_p10)
}
  0x19   :  { %s365_s8 = scalar_lea.vmem %s31_s27, 16  ;;  %s369_s1 = scalar_lea.vmem %s31_s27, 32 }
  0x1a   :  { %p366_p11 = scmp.ne.s32.totalorder %s31_s27, %s365_s8  ;;  %p370_p12 = scmp.lt.s32.totalorder %s31_s27, %s31_s27 }
  0x1b   :  { %p371_p13 = scmp.lt.s32.totalorder %s369_s1, %s365_s8 }
  0x1d   :  { %p372_p0 = por %p371_p13, %p370_p12 }
  0x1f   :  { %p373_p1 = pnand %p372_p0, %p366_p11 }
  0x21   :  { %376 = shalt.err (!%p373_p1)
}
  0x22   :  { %33 = dma.hbm_to_vmem [thread:$0]  %s527_s2, 16, %s31_s27, [#allocation5]  }
  0x23   :  { %377 = dma.done.wait [#allocation3], 128  }
  0x24   :  { %378 = vsyncadd [#allocation3], 4294967168 }
  0x25   :  { %379 = dma.done.wait [#allocation5], 16  }
  0x26   :  { %380 = vsyncadd [#allocation5], 4294967280  ;;  %v324_v0 = vld [vmem:[#allocation2] sm:$0xff]   ;;  %vm112_vm0 = vcmask 130048   ;;  %v327_v3 = vld [vmem:[%s525_s0 + $0x8] sm:$0xff]   ;;  %vm250_vm1 = vcmask 523264  }
  0x27   :  { %v325_v1 = vld [vmem:[%s525_s0] sm:$0xff]   ;;  %300 = vmatprep.subr.bf16.mxu0 %v324_v0  ;;  %318 = vmatprep.subr.bf16.mxu1 %v324_v0  ;;  %v328_v4 = vld [vmem:[%s525_s0 + $0x28] sm:$0xff]   ;;  %v329_v5 = vld [vmem:[%s525_s0 + $0x10] sm:$0xff]  }
  0x28   :  { %v326_v2 = vld [vmem:[%s525_s0 + $0x20] sm:$0xff]   ;;  %301 = vmatpush3.bf16.msra.mxu0 %v324_v0  ;;  %319 = vmatpush3.bf16.msra.mxu1 %v324_v0  ;;  %v330_v6 = vld [vmem:[%s525_s0 + $0x30] sm:$0xff]   ;;  %v331_v7 = vld [vmem:[%s525_s0 + $0x18] sm:$0xff]  }
  0x29   :  { %302 = vmatprep.mubr.msk.bf16.mxu0 %vm112_vm0, %v325_v1  ;;  %310 = vmatprep.mubr.msk.bf16.mxu1 %vm112_vm0, %v326_v2  ;;  %v332_v8 = vld [vmem:[%s525_s0 + $0x38] sm:$0xff]   ;;  %v273_v9 = vld [vmem:[#allocation4] ss:$0 sm:$0xff] }
  0x2b   :  { %303 = vmatmul.mubr.msk.bf16.vlgmr.msra.gmra.mrb[0].mxu0 %vm112_vm0, %v327_v3  ;;  %311 = vmatmul.mubr.msk.bf16.vlgmr.msra.gmra.mrb[0].mxu1 %vm112_vm0, %v328_v4 }
  0x2c   :  { %306 = vmatprep.mubr.msk.bf16.mxu0 %vm112_vm0, %v329_v5  ;;  %314 = vmatprep.mubr.msk.bf16.mxu1 %vm112_vm0, %v330_v6 }
  0x33   :  { %307 = vmatmul.mubr.msk.bf16.gmra.mrb[4].mxu0 %vm112_vm0, %v331_v7  ;;  %315 = vmatmul.mubr.msk.bf16.gmra.mrb[4].mxu1 %vm112_vm0, %v332_v8 }
  0xfe   :  { %v304_v10 = vpop.f32.mrb[0].mxu0  ;;  %v312_v11 = vpop.f32.mrb[0].mxu1 }
  0xff   :  { %v180_v12 = vadd.f32 %v304_v10, %v273_v9  ;;  %v212_v13 = vadd.f32 %v312_v11, %v273_v9  ;;  %v171_v14 = vpop.f32.mrb[1].mxu0  ;;  %v203_v15 = vpop.f32.mrb[1].mxu1 }
 0x100   :  { %v172_v16 = vadd.f32 %v273_v9, %v171_v14  ;;  %v204_v17 = vadd.f32 %v273_v9, %v203_v15  ;;  %v305_v18 = vpop.f32.mrb[2].mxu0  ;;  %v313_v19 = vpop.f32.mrb[2].mxu1 }
 0x101   :  { %v236_v20 = vmax.f32 %v180_v12, 0.0  ;;  %v244_v21 = vmax.f32 %v212_v13, 0.0  ;;  %v183_v22 = vadd.f32 %v305_v18, %v273_v9  ;;  %v215_v23 = vadd.f32 %v313_v19, %v273_v9  ;;  %v174_v24 = vpop.f32.mrb[3].mxu0  ;;  %v206_v25 = vpop.f32.mrb[3].mxu1 }
 0x102   :  { %v234_v26 = vmax.f32 %v172_v16, 0.0  ;;  %v242_v27 = vmax.f32 %v204_v17, 0.0  ;;  %v175_v28 = vadd.f32 %v273_v9, %v174_v24  ;;  %v207_v29 = vadd.f32 %v273_v9, %v206_v25 }
 0x103   :  { %253 = vst.msk [vmem:[%s528_s3 + $0x10] sm:$0xff] %vm250_vm1, %v236_v20  ;;  %261 = vst.msk [vmem:[%s528_s3 + $0x50] sm:$0xff] %vm250_vm1, %v244_v21  ;;  %v237_v30 = vmax.f32 %v183_v22, 0.0  ;;  %v245_v31 = vmax.f32 %v215_v23, 0.0 }
 0x104   :  { %251 = vst.msk [vmem:[%s528_s3] sm:$0xff] %vm250_vm1, %v234_v26  ;;  %259 = vst.msk [vmem:[%s528_s3 + $0x40] sm:$0xff] %vm250_vm1, %v242_v27  ;;  %v235_v32 = vmax.f32 %v175_v28, 0.0  ;;  %v243_v33 = vmax.f32 %v207_v29, 0.0 }
 0x105   :  { %254 = vst.msk [vmem:[%s528_s3 + $0x18] sm:$0xff] %vm250_vm1, %v237_v30  ;;  %262 = vst.msk [vmem:[%s528_s3 + $0x58] sm:$0xff] %vm250_vm1, %v245_v31 }
 0x106   :  { %252 = vst.msk [vmem:[%s528_s3 + $0x8] sm:$0xff] %vm250_vm1, %v235_v32  ;;  %260 = vst.msk [vmem:[%s528_s3 + $0x48] sm:$0xff] %vm250_vm1, %v243_v33  ;;  %v308_v34 = vpop.f32.mrb[4].mxu0  ;;  %v316_v35 = vpop.f32.mrb[4].mxu1 }
 0x107   :  { %v196_v36 = vadd.f32 %v308_v34, %v273_v9  ;;  %v228_v37 = vadd.f32 %v316_v35, %v273_v9  ;;  %v187_v38 = vpop.f32.mrb[5].mxu0  ;;  %v219_v39 = vpop.f32.mrb[5].mxu1 }
 0x108   :  { %v188_v40 = vadd.f32 %v273_v9, %v187_v38  ;;  %v220_v41 = vadd.f32 %v273_v9, %v219_v39  ;;  %v309_v42 = vpop.f32.mrb[6].mxu0  ;;  %v317_v43 = vpop.f32.mrb[6].mxu1 }
 0x109   :  { %v240_v44 = vmax.f32 %v196_v36, 0.0  ;;  %v248_v45 = vmax.f32 %v228_v37, 0.0  ;;  %v199_v46 = vadd.f32 %v309_v42, %v273_v9  ;;  %v231_v47 = vadd.f32 %v317_v43, %v273_v9  ;;  %v190_v48 = vpop.f32.mrb[7].mxu0  ;;  %v222_v49 = vpop.f32.mrb[7].mxu1 }
 0x10a   :  { %v238_v50 = vmax.f32 %v188_v40, 0.0  ;;  %v246_v51 = vmax.f32 %v220_v41, 0.0  ;;  %v191_v52 = vadd.f32 %v273_v9, %v190_v48  ;;  %v223_v53 = vadd.f32 %v273_v9, %v222_v49 }
 0x10b   :  { %257 = vst.msk [vmem:[%s528_s3 + $0x30] sm:$0xff] %vm250_vm1, %v240_v44  ;;  %265 = vst.msk [vmem:[%s528_s3 + $0x70] sm:$0xff] %vm250_vm1, %v248_v45  ;;  %v241_v54 = vmax.f32 %v199_v46, 0.0  ;;  %v249_v55 = vmax.f32 %v231_v47, 0.0 }
 0x10c   :  { %255 = vst.msk [vmem:[%s528_s3 + $0x20] sm:$0xff] %vm250_vm1, %v238_v50  ;;  %263 = vst.msk [vmem:[%s528_s3 + $0x60] sm:$0xff] %vm250_vm1, %v246_v51  ;;  %v239_v56 = vmax.f32 %v191_v52, 0.0  ;;  %v247_v57 = vmax.f32 %v223_v53, 0.0 }
 0x10d   :  { %258 = vst.msk [vmem:[%s528_s3 + $0x38] sm:$0xff] %vm250_vm1, %v241_v54  ;;  %266 = vst.msk [vmem:[%s528_s3 + $0x78] sm:$0xff] %vm250_vm1, %v249_v55 }
 0x10e   :  { %256 = vst.msk [vmem:[%s528_s3 + $0x28] sm:$0xff] %vm250_vm1, %v239_v56  ;;  %264 = vst.msk [vmem:[%s528_s3 + $0x68] sm:$0xff] %vm250_vm1, %v247_v57 }
 0x10f   :  { %271 = vsyncpa [#allocation3], 1 }
 0x110   :  { %272 = vsyncpa [#allocation5], 1 }

// kernel: encoder_forward.3
= control target key start
LH: loop header
LB: loop body
LE: loop exit
PB: predicated region body
PF: predicated region fallthrough
CT: control target
= control target key end

     0   :  { %s4681_s29 = smov 0   ;;  %s5449_s0 = inlined_call_operand.vmem [shape: bf16[4,8,1024], index: 0, kind: input, shape index: {}]   ;;  %s5450_s1 = inlined_call_operand.vmem [shape: bf16[1024,128], index: 1, kind: input, shape index: {}]   ;;  %s5451_s2 = inlined_call_operand.vmem [shape: f32[1,128], index: 2, kind: input, shape index: {}]   ;;  %s5452_s3 = inlined_call_operand.vmem [shape: bf16[2048,1024], index: 3, kind: input, shape index: {}]   ;;  %s5453_s4 = inlined_call_operand.vmem [shape: f32[1,1024], index: 4, kind: input, shape index: {}]   ;;  %s5454_s5 = inlined_call_operand.vmem [shape: bf16[1024,128], index: 5, kind: input, shape index: {}]   ;;  %s5455_s6 = inlined_call_operand.vmem [shape: f32[1,128], index: 6, kind: input, shape index: {}]   ;;  %s5456_s7 = inlined_call_operand.<no memory space> [shape: f32[1], index: 7, kind: input, shape index: {}]   ;;  %s5457_s8 = inlined_call_operand.vmem [shape: f32[2,128], index: 8, kind: output, shape index: {}]  }
   0x1   :  { %13 = sst [smem:[#allocation3]] %s5456_s7 }
   0x2 LB: > { %s4687_s30 = sadd.s32 4294967295, %s4628_s29   ;;  %p3871_p0 = scmp.ge.s32.totalorder %s4628_s29, 1  ;;  %s4628_s29 = sphi %s4681_s29, %s19_s29  }
   0x3   : > { %p270_p1 = scmp.lt.s32.totalorder %s4628_s29, 5 }
   0x5   : > { %p271_p2 = pnand %p3871_p0, %p270_p1 }
   0x6   : > { %p305_p3 = scmp.lt.s32.totalorder (!%p271_p2), %s4687_s30, 3  ;;  %s3874_s7 = sshll.u32 (!%p271_p2), %s4687_s30, 6 }
   0x7   : > { %274 = sbr.rel (%p271_p2) target bundleno = 1152 (0x480), region = 52  ;;  %p311_p4 = scmp.lt.s32.totalorder (!%p271_p2), %s3874_s7, 255 }
   0x8   : > { %p3877_p5 = scmp.ne.s32.totalorder (!%p271_p2), %s4687_s30, 0 }
   0xe   : > { %s306_s9 = scalar_select %p305_p3, %s4687_s30, 3 }
   0xf   : > { %s5459_s7 = smov (!%p311_p4, %s3874_s7), 255  ;;  %321 = sbr.rel (%p3877_p5) target bundleno = 22 (0x16), region = 56 }
  0x10   : > { %s4275_s10 = sshll.u32 %s306_s9, 5  ;;  %s4276_s14 = sshll.u32 %s5459_s7, 5  ;;  %v4630_v0 = vmov (!%p3877_p5), 0.0  }
  0x11   : > { %s4697_s13 = scalar_lea.vmem %s5449_s0, %s4275_s10  ;;  %s4702_s17 = scalar_lea.vmem %s5452_s3, %s4276_s14  ;;  %322 = vst [vmem:[#allocation2] sm:$0xff] (!%p3877_p5), %v4630_v0  ;;  %323 = vst [vmem:[#allocation2 + $0x8] sm:$0xff] (!%p3877_p5), %v4630_v0 }
  0x16 PF: > { %v4480_v1 = vld [vmem:[%s5450_s1 + $0x40] sm:$0xff]   ;;  %v4484_v5 = vld [vmem:[%s5450_s1 + $0x48] sm:$0xff]   ;;  %v4488_v9 = vld [vmem:[%s5450_s1 + $0x50] sm:$0xff]   ;;  %p4207_p6 = scmp.ne.s32.totalorder %s4687_s30, 3 }
  0x17   : > { %v4481_v2 = vld [vmem:[%s5450_s1 + $0xc0] sm:$0xff]   ;;  %4277 = vmatprep.subr.bf16.mxu0 %v4480_v1  ;;  %v4485_v6 = vld [vmem:[%s5450_s1 + $0xc8] sm:$0xff]   ;;  %v4489_v10 = vld [vmem:[%s5450_s1 + $0xd0] sm:$0xff]   ;;  %vm3799_vm1 = vcmask (!%p4207_p6), 1041408  }
  0x18   : > { %v4482_v3 = vld [vmem:[%s5450_s1] sm:$0xff]   ;;  %4299 = vmatprep.subr.bf16.mxu1 %v4481_v2  ;;  %v4486_v7 = vld [vmem:[%s5450_s1 + $0x8] sm:$0xff]   ;;  %v4490_v11 = vld [vmem:[%s5450_s1 + $0x10] sm:$0xff]  }
  0x19   : > { %v4483_v4 = vld [vmem:[%s5450_s1 + $0x80] sm:$0xff]   ;;  %4278 = vmatpush3.bf16.msra.mxu0 %v4482_v3  ;;  %v4487_v8 = vld [vmem:[%s5450_s1 + $0x88] sm:$0xff]   ;;  %v4491_v12 = vld [vmem:[%s5450_s1 + $0x90] sm:$0xff]  }
  0x1a   : > { %4300 = vmatpush3.bf16.msra.mxu1 %v4483_v4  ;;  %4279 = vmatprep.subr.bf16.mxu0 %v4484_v5  ;;  %v4492_v13 = vld [vmem:[%s5450_s1 + $0x58] sm:$0xff]   ;;  %v4496_v17 = vld [vmem:[%s5450_s1 + $0x60] sm:$0xff]   ;;  %v4500_v21 = vld [vmem:[%s5450_s1 + $0x68] sm:$0xff]  }
  0x1b   : > { %4301 = vmatprep.subr.bf16.mxu1 %v4485_v6  ;;  %v4493_v14 = vld [vmem:[%s5450_s1 + $0xd8] sm:$0xff]   ;;  %v4497_v18 = vld [vmem:[%s5450_s1 + $0xe0] sm:$0xff]   ;;  %v4501_v22 = vld [vmem:[%s5450_s1 + $0xe8] sm:$0xff]  }
  0x1c   : > { %v4494_v15 = vld [vmem:[%s5450_s1 + $0x18] sm:$0xff]   ;;  %v4498_v19 = vld [vmem:[%s5450_s1 + $0x20] sm:$0xff]   ;;  %v4502_v23 = vld [vmem:[%s5450_s1 + $0x28] sm:$0xff]  }
  0x1d   : > { %4280 = vmatpush3.bf16.msra.mxu0 %v4486_v7  ;;  %v4495_v16 = vld [vmem:[%s5450_s1 + $0x98] sm:$0xff]   ;;  %v4499_v20 = vld [vmem:[%s5450_s1 + $0xa0] sm:$0xff]   ;;  %v4503_v24 = vld [vmem:[%s5450_s1 + $0xa8] sm:$0xff]  }
  0x1e   : > { %4302 = vmatpush3.bf16.msra.mxu1 %v4487_v8  ;;  %4281 = vmatprep.subr.bf16.mxu0 %v4488_v9  ;;  %v4504_v25 = vld [vmem:[%s5450_s1 + $0x70] sm:$0xff]   ;;  %v4508_v29 = vld [vmem:[%s5450_s1 + $0x78] sm:$0xff]   ;;  %v324_v33 = vld [vmem:[%s4697_s13] sm:$0xff] }
  0x1f   : > { %4303 = vmatprep.subr.bf16.mxu1 %v4489_v10  ;;  %v4505_v26 = vld [vmem:[%s5450_s1 + $0xf0] sm:$0xff]   ;;  %v4509_v30 = vld [vmem:[%s5450_s1 + $0xf8] sm:$0xff]   ;;  %v325_v34 = vld [vmem:[%s4697_s13 + $0x8] sm:$0xff]  ;;  %v3879_v35 = vcombine.low %v324_v33, %v324_v33  ;;  %v3880_v36 = vcombine.high %v324_v33, %v324_v33 }
  0x20   : > { %v4506_v27 = vld [vmem:[%s5450_s1 + $0x30] sm:$0xff]   ;;  %v4510_v31 = vld [vmem:[%s5450_s1 + $0x38] sm:$0xff]   ;;  %v3881_v37 = vcombine.low %v325_v34, %v325_v34  ;;  %v3882_v38 = vcombine.high %v325_v34, %v325_v34  ;;  %v4516_v39 = vld [vmem:[%s5450_s1 + $0x140] sm:$0xff]  }
  0x21   : > { %4282 = vmatpush3.bf16.msra.mxu0 %v4490_v11  ;;  %v4507_v28 = vld [vmem:[%s5450_s1 + $0xb0] sm:$0xff]   ;;  %v4511_v32 = vld [vmem:[%s5450_s1 + $0xb8] sm:$0xff]   ;;  %v4517_v40 = vld [vmem:[%s5450_s1 + $0x1c0] sm:$0xff]   ;;  %907 = vmatprep.mubr.bf16.mxu0 %v3880_v36 }
  0x22   : > { %4304 = vmatpush3.bf16.msra.mxu1 %v4491_v12  ;;  %4283 = vmatprep.subr.bf16.mxu0 %v4492_v13  ;;  %v4518_v41 = vld [vmem:[%s5450_s1 + $0x100] sm:$0xff]   ;;  %v4520_v43 = vld [vmem:[%s5450_s1 + $0x148] sm:$0xff]   ;;  %v4524_v47 = vld [vmem:[%s5450_s1 + $0x150] sm:$0xff]  }
  0x23   : > { %4305 = vmatprep.subr.bf16.mxu1 %v4493_v14  ;;  %947 = vmatprep.mubr.bf16.mxu1 %v3882_v38  ;;  %v4519_v42 = vld [vmem:[%s5450_s1 + $0x180] sm:$0xff]   ;;  %v4521_v44 = vld [vmem:[%s5450_s1 + $0x1c8] sm:$0xff]   ;;  %v4525_v48 = vld [vmem:[%s5450_s1 + $0x1d0] sm:$0xff]  }
  0x24   : > { %v4522_v45 = vld [vmem:[%s5450_s1 + $0x108] sm:$0xff]   ;;  %v4526_v49 = vld [vmem:[%s5450_s1 + $0x110] sm:$0xff]   ;;  %v4528_v51 = vld [vmem:[%s5450_s1 + $0x158] sm:$0xff]  }
  0x25   : > { %4284 = vmatpush3.bf16.msra.mxu0 %v4494_v15  ;;  %v4523_v46 = vld [vmem:[%s5450_s1 + $0x188] sm:$0xff]   ;;  %v4527_v50 = vld [vmem:[%s5450_s1 + $0x190] sm:$0xff]   ;;  %v4529_v52 = vld [vmem:[%s5450_s1 + $0x1d8] sm:$0xff]  }
  0x26   : > { %4306 = vmatpush3.bf16.msra.mxu1 %v4495_v16  ;;  %4285 = vmatprep.subr.bf16.mxu0 %v4496_v17  ;;  %v4530_v53 = vld [vmem:[%s5450_s1 + $0x118] sm:$0xff]   ;;  %v4532_v55 = vld [vmem:[%s5450_s1 + $0x160] sm:$0xff]   ;;  %v4536_v59 = vld [vmem:[%s5450_s1 + $0x168] sm:$0xff]  }
  0x27   : > { %4307 = vmatprep.subr.bf16.mxu1 %v4497_v18  ;;  %v4531_v54 = vld [vmem:[%s5450_s1 + $0x198] sm:$0xff]   ;;  %v4533_v56 = vld [vmem:[%s5450_s1 + $0x1e0] sm:$0xff]   ;;  %v4537_v60 = vld [vmem:[%s5450_s1 + $0x1e8] sm:$0xff]  }
  0x28   : > { %v4534_v57 = vld [vmem:[%s5450_s1 + $0x120] sm:$0xff]   ;;  %v4538_v61 = vld [vmem:[%s5450_s1 + $0x128] sm:$0xff]   ;;  %v4540_v63 = vld [vmem:[%s5450_s1 + $0x170] sm:$0xff]  }
  0x29   : > { %4286 = vmatpush3.bf16.msra.mxu0 %v4498_v19  ;;  %v4535_v58 = vld [vmem:[%s5450_s1 + $0x1a0] sm:$0xff]   ;;  %v4539_v62 = vld [vmem:[%s5450_s1 + $0x1a8] sm:$0xff]   ;;  %v4541_v0 = vld [vmem:[%s5450_s1 + $0x1f0] sm:$0xff]  }
  0x2a   : > { %4308 = vmatpush3.bf16.msra.mxu1 %v4499_v20  ;;  %4287 = vmatprep.subr.bf16.mxu0 %v4500_v21  ;;  %v4542_v1 = vld [vmem:[%s5450_s1 + $0x130] sm:$0xff]   ;;  %v4544_v3 = vld [vmem:[%s5450_s1 + $0x178] sm:$0xff]   ;;  %v1071_v11 = vld [vmem:[%s4702_s17] sm:$0xff] }
  0x2b   : > { %4309 = vmatprep.subr.bf16.mxu1 %v4501_v22  ;;  %v4543_v2 = vld [vmem:[%s5450_s1 + $0x1b0] sm:$0xff]   ;;  %v4545_v4 = vld [vmem:[%s5450_s1 + $0x1f8] sm:$0xff]   ;;  %v1075_v12 = vld [vmem:[%s4702_s17 + $0x20] sm:$0xff] }
  0x2c   : > { %v4546_v5 = vld [vmem:[%s5450_s1 + $0x138] sm:$0xff]   ;;  %v326_v7 = vld [vmem:[%s4697_s13 + $0x10] sm:$0xff]  ;;  %v1072_v15 = vld [vmem:[%s4702_s17 + $0x8] sm:$0xff]  ;;  %v3951_v18 = vcombine.low %v1071_v11, %v1075_v12  ;;  %v3952_v19 = vcombine.high %v1071_v11, %v1075_v12 }
  0x2d   : > { %4288 = vmatpush3.bf16.msra.mxu0 %v4502_v23  ;;  %v4547_v6 = vld [vmem:[%s5450_s1 + $0x1b8] sm:$0xff]   ;;  %v3883_v8 = vcombine.low %v326_v7, %v326_v7  ;;  %v3884_v9 = vcombine.high %v326_v7, %v326_v7  ;;  %v1076_v16 = vld [vmem:[%s4702_s17 + $0x28] sm:$0xff]  ;;  %v1079_v17 = vld [vmem:[%s4702_s17 + $0x40] sm:$0xff] }
  0x2e   : > { %4310 = vmatpush3.bf16.msra.mxu1 %v4503_v24  ;;  %4289 = vmatprep.subr.bf16.mxu0 %v4504_v25  ;;  %v327_v10 = vld [vmem:[%s4697_s13 + $0x18] sm:$0xff]  ;;  %v3953_v20 = vcombine.low %v1072_v15, %v1076_v16  ;;  %v3954_v21 = vcombine.high %v1072_v15, %v1076_v16  ;;  %v1083_v22 = vld [vmem:[%s4702_s17 + $0x60] sm:$0xff]  ;;  %v1080_v23 = vld [vmem:[%s4702_s17 + $0x48] sm:$0xff] }
  0x2f   : > { %4311 = vmatprep.subr.bf16.mxu1 %v4505_v26  ;;  %v3885_v13 = vcombine.low %v327_v10, %v327_v10  ;;  %v3886_v14 = vcombine.high %v327_v10, %v327_v10  ;;  %v1084_v24 = vld [vmem:[%s4702_s17 + $0x68] sm:$0xff]  ;;  %v3960_v25 = vcombine.high %v1079_v17, %v1083_v22  ;;  %v1099_v36 = vld [vmem:[%s4702_s17 + $0xe0] sm:$0xff] }
  0x30   : > { %v3962_v26 = vcombine.high %v1080_v23, %v1084_v24  ;;  %v1100_v38 = vld [vmem:[%s4702_s17 + $0xe8] sm:$0xff]  ;;  %v1135_v11 = vld [vmem:[%s4702_s17 + $0x200] sm:$0xff] }
  0x31   : > { %4290 = vmatpush3.bf16.msra.mxu0 %v4506_v27  ;;  %v1087_v27 = vld [vmem:[%s4702_s17 + $0x80] sm:$0xff]  ;;  %v1132_v7 = vld [vmem:[%s4702_s17 + $0x1e8] sm:$0xff] }
  0x32   : > { %4312 = vmatpush3.bf16.msra.mxu1 %v4507_v28  ;;  %4291 = vmatprep.subr.bf16.mxu0 %v4508_v29  ;;  %v1091_v28 = vld [vmem:[%s4702_s17 + $0xa0] sm:$0xff]  ;;  %v1088_v29 = vld [vmem:[%s4702_s17 + $0x88] sm:$0xff] }
  0x33   : > { %4313 = vmatprep.subr.bf16.mxu1 %v4509_v30  ;;  %v1092_v30 = vld [vmem:[%s4702_s17 + $0xa8] sm:$0xff]  ;;  %v3968_v33 = vcombine.high %v1087_v27, %v1091_v28  ;;  %v1139_v12 = vld [vmem:[%s4702_s17 + $0x220] sm:$0xff] }
  0x34   : > { %v3970_v34 = vcombine.high %v1088_v29, %v1092_v30 }
  0x35   : > { %4292 = vmatpush3.bf16.msra.mxu0 %v4510_v31  ;;  %v3959_v31 = vcombine.low %v1079_v17, %v1083_v22  ;;  %v4016_v17 = vcombine.high %v1135_v11, %v1139_v12  ;;  %v1148_v22 = vld [vmem:[%s4702_s17 + $0x268] sm:$0xff] }
  0x36   : > { %4314 = vmatpush3.bf16.msra.mxu1 %v4511_v32  ;;  %4321 = vmatprep.subr.bf16.mxu0 %v4516_v39  ;;  %v3961_v32 = vcombine.low %v1080_v23, %v1084_v24  ;;  %v3967_v39 = vcombine.low %v1087_v27, %v1091_v28  ;;  %v4015_v23 = vcombine.low %v1135_v11, %v1139_v12  ;;  %v1151_v27 = vld [vmem:[%s4702_s17 + $0x280] sm:$0xff] }
  0x37   : > { %4343 = vmatprep.subr.bf16.mxu1 %v4517_v40  ;;  %v3969_v40 = vcombine.low %v1088_v29, %v1092_v30  ;;  %v1155_v28 = vld [vmem:[%s4702_s17 + $0x2a0] sm:$0xff]  ;;  %v1152_v29 = vld [vmem:[%s4702_s17 + $0x288] sm:$0xff] }
  0x38   : > { %908 = vmatmul.mubr.bf16.vlgmr.msra.gmra.mrb[0].mxu0 %v3879_v35  ;;  %v1095_v35 = vld [vmem:[%s4702_s17 + $0xc0] sm:$0xff]  ;;  %v1156_v30 = vld [vmem:[%s4702_s17 + $0x2a8] sm:$0xff] }
  0x39   : > { %948 = vmatmul.mubr.bf16.vlgmr.msra.gmra.mrb[0].mxu1 %v3881_v37  ;;  %4322 = vmatpush3.bf16.msra.mxu0 %v4518_v41  ;;  %v1096_v37 = vld [vmem:[%s4702_s17 + $0xc8] sm:$0xff]  ;;  %v3976_v41 = vcombine.high %v1095_v35, %v1099_v36 }
  0x3a   : > { %4344 = vmatpush3.bf16.msra.mxu1 %v4519_v42  ;;  %4323 = vmatprep.subr.bf16.mxu0 %v4520_v43  ;;  %v3978_v42 = vcombine.high %v1096_v37, %v1100_v38  ;;  %v3975_v43 = vcombine.low %v1095_v35, %v1099_v36  ;;  %v1159_v35 = vld [vmem:[%s4702_s17 + $0x2c0] sm:$0xff] }
  0x3b   : > { %4345 = vmatprep.subr.bf16.mxu1 %v4521_v44  ;;  %987 = vmatprep.mubr.bf16.mxu0 %v3884_v9  ;;  %v3977_v44 = vcombine.low %v1096_v37, %v1100_v38  ;;  %v1163_v36 = vld [vmem:[%s4702_s17 + $0x2e0] sm:$0xff]  ;;  %v1160_v37 = vld [vmem:[%s4702_s17 + $0x2c8] sm:$0xff] }
  0x3c   : > { %1027 = vmatprep.mubr.bf16.mxu1 %v3886_v14  ;;  %v1140_v14 = vld [vmem:[%s4702_s17 + $0x228] sm:$0xff] }
  0x3d   : > { %4324 = vmatpush3.bf16.msra.mxu0 %v4522_v45  ;;  %v1103_v45 = vld [vmem:[%s4702_s17 + $0x100] sm:$0xff]  ;;  %v1164_v38 = vld [vmem:[%s4702_s17 + $0x2e8] sm:$0xff] }
  0x3e   : > { %4346 = vmatpush3.bf16.msra.mxu1 %v4523_v46  ;;  %4325 = vmatprep.subr.bf16.mxu0 %v4524_v47  ;;  %v1107_v46 = vld [vmem:[%s4702_s17 + $0x120] sm:$0xff] }
  0x3f   : > { %4347 = vmatprep.subr.bf16.mxu1 %v4525_v48  ;;  %v3984_v47 = vcombine.high %v1103_v45, %v1107_v46  ;;  %v1104_v48 = vld [vmem:[%s4702_s17 + $0x108] sm:$0xff] }
  0x41   : > { %4326 = vmatpush3.bf16.msra.mxu0 %v4526_v49  ;;  %v1108_v49 = vld [vmem:[%s4702_s17 + $0x128] sm:$0xff] }
  0x42   : > { %4348 = vmatpush3.bf16.msra.mxu1 %v4527_v50  ;;  %4327 = vmatprep.subr.bf16.mxu0 %v4528_v51  ;;  %v3983_v50 = vcombine.low %v1103_v45, %v1107_v46  ;;  %v3985_v51 = vcombine.low %v1104_v48, %v1108_v49  ;;  %v1167_v45 = vld [vmem:[%s4702_s17 + $0x300] sm:$0xff] }
  0x43   : > { %4349 = vmatprep.subr.bf16.mxu1 %v4529_v52  ;;  %v3986_v52 = vcombine.high %v1104_v48, %v1108_v49  ;;  %v1171_v46 = vld [vmem:[%s4702_s17 + $0x320] sm:$0xff]  ;;  %v1172_v49 = vld [vmem:[%s4702_s17 + $0x328] sm:$0xff] }
  0x44   : > { %v4048_v48 = vcombine.high %v1167_v45, %v1171_v46 }
  0x45   : > { %4328 = vmatpush3.bf16.msra.mxu0 %v4530_v53  ;;  %v1111_v53 = vld [vmem:[%s4702_s17 + $0x140] sm:$0xff] }
  0x46   : > { %4350 = vmatpush3.bf16.msra.mxu1 %v4531_v54  ;;  %4329 = vmatprep.subr.bf16.mxu0 %v4532_v55  ;;  %v1115_v54 = vld [vmem:[%s4702_s17 + $0x160] sm:$0xff]  ;;  %v1112_v55 = vld [vmem:[%s4702_s17 + $0x148] sm:$0xff] }
  0x47   : > { %4351 = vmatprep.subr.bf16.mxu1 %v4533_v56  ;;  %v3992_v56 = vcombine.high %v1111_v53, %v1115_v54 }
  0x49   : > { %4330 = vmatpush3.bf16.msra.mxu0 %v4534_v57  ;;  %v1116_v57 = vld [vmem:[%s4702_s17 + $0x168] sm:$0xff] }
  0x4a   : > { %4352 = vmatpush3.bf16.msra.mxu1 %v4535_v58  ;;  %4331 = vmatprep.subr.bf16.mxu0 %v4536_v59  ;;  %v3991_v58 = vcombine.low %v1111_v53, %v1115_v54  ;;  %v3993_v59 = vcombine.low %v1112_v55, %v1116_v57  ;;  %v1175_v53 = vld [vmem:[%s4702_s17 + $0x340] sm:$0xff] }
  0x4b   : > { %4353 = vmatprep.subr.bf16.mxu1 %v4537_v60  ;;  %v3994_v60 = vcombine.high %v1112_v55, %v1116_v57  ;;  %v1179_v54 = vld [vmem:[%s4702_s17 + $0x360] sm:$0xff]  ;;  %v1176_v55 = vld [vmem:[%s4702_s17 + $0x348] sm:$0xff] }
  0x4c   : > { %v1180_v57 = vld [vmem:[%s4702_s17 + $0x368] sm:$0xff] }
  0x4d   : > { %4332 = vmatpush3.bf16.msra.mxu0 %v4538_v61  ;;  %v1119_v61 = vld [vmem:[%s4702_s17 + $0x180] sm:$0xff] }
  0x4e   : > { %4354 = vmatpush3.bf16.msra.mxu1 %v4539_v62  ;;  %4333 = vmatprep.subr.bf16.mxu0 %v4540_v63  ;;  %v1123_v62 = vld [vmem:[%s4702_s17 + $0x1a0] sm:$0xff]  ;;  %v1120_v63 = vld [vmem:[%s4702_s17 + $0x188] sm:$0xff] }
  0x4f   : > { %4355 = vmatprep.subr.bf16.mxu1 %v4541_v0  ;;  %v4000_v0 = vcombine.high %v1119_v61, %v1123_v62 }
  0x51   : > { %4334 = vmatpush3.bf16.msra.mxu0 %v4542_v1  ;;  %v1124_v1 = vld [vmem:[%s4702_s17 + $0x1a8] sm:$0xff] }
  0x52   : > { %4356 = vmatpush3.bf16.msra.mxu1 %v4543_v2  ;;  %4335 = vmatprep.subr.bf16.mxu0 %v4544_v3  ;;  %v1127_v2 = vld [vmem:[%s4702_s17 + $0x1c0] sm:$0xff] }
  0x53   : > { %4357 = vmatprep.subr.bf16.mxu1 %v4545_v4  ;;  %v1131_v3 = vld [vmem:[%s4702_s17 + $0x1e0] sm:$0xff]  ;;  %v3999_v4 = vcombine.low %v1119_v61, %v1123_v62 }
  0x54   : > { %v4008_v9 = vcombine.high %v1127_v2, %v1131_v3  ;;  %v4007_v15 = vcombine.low %v1127_v2, %v1131_v3  ;;  %v1183_v61 = vld [vmem:[%s4702_s17 + $0x380] sm:$0xff] }
  0x55   : > { %4336 = vmatpush3.bf16.msra.mxu0 %v4546_v5  ;;  %v4002_v5 = vcombine.high %v1120_v63, %v1124_v1  ;;  %v1187_v62 = vld [vmem:[%s4702_s17 + $0x3a0] sm:$0xff] }
  0x56   : > { %4358 = vmatpush3.bf16.msra.mxu1 %v4547_v6  ;;  %2607 = vmatprep.subr.bf16.mxu0 %v3952_v19  ;;  %v1128_v6 = vld [vmem:[%s4702_s17 + $0x1c8] sm:$0xff]  ;;  %v1143_v19 = vld [vmem:[%s4702_s17 + $0x240] sm:$0xff]  ;;  %v4063_v2 = vcombine.low %v1183_v61, %v1187_v62 }
  0x57   : > { %2689 = vmatprep.subr.bf16.mxu1 %v3954_v21  ;;  %v4010_v10 = vcombine.high %v1128_v6, %v1132_v7  ;;  %v4009_v16 = vcombine.low %v1128_v6, %v1132_v7  ;;  %v1144_v21 = vld [vmem:[%s4702_s17 + $0x248] sm:$0xff]  ;;  %v1195_v6 = vld [vmem:[%s4702_s17 + $0x3e0] sm:$0xff] }
  0x58   : > { %988 = vmatmul.mubr.bf16.vlgmr.msra.gmra.mrb[4].mxu0 %v3883_v8  ;;  %v4001_v8 = vcombine.low %v1120_v63, %v1124_v1  ;;  %v1184_v63 = vld [vmem:[%s4702_s17 + $0x388] sm:$0xff] }
  0x59   : > { %1028 = vmatmul.mubr.bf16.vlgmr.msra.gmra.mrb[4].mxu1 %v3885_v13  ;;  %2608 = vmatpush1.bf16.msra.mxu0 %v3951_v18  ;;  %v1136_v13 = vld [vmem:[%s4702_s17 + $0x208] sm:$0xff] }
  0x5a   : > { %2690 = vmatpush1.bf16.msra.mxu1 %v3953_v20  ;;  %2609 = vmatprep.subr.bf16.mxu0 %v3960_v25  ;;  %v4018_v18 = vcombine.high %v1136_v13, %v1140_v14  ;;  %v1147_v20 = vld [vmem:[%s4702_s17 + $0x260] sm:$0xff]  ;;  %v4017_v24 = vcombine.low %v1136_v13, %v1140_v14  ;;  %v1188_v1 = vld [vmem:[%s4702_s17 + $0x3a8] sm:$0xff] }
  0x5b   : > { %2691 = vmatprep.subr.bf16.mxu1 %v3962_v26  ;;  %v4024_v25 = vcombine.high %v1143_v19, %v1147_v20  ;;  %v4026_v26 = vcombine.high %v1144_v21, %v1148_v22  ;;  %v4065_v3 = vcombine.low %v1184_v63, %v1188_v1  ;;  %v1192_v7 = vld [vmem:[%s4702_s17 + $0x3c8] sm:$0xff]  ;;  %v4966_v13 = vld [vmem:[%s4702_s17 + $0x400] sm:$0xff] }
  0x5c   : > { %v4969_v14 = vld [vmem:[%s4702_s17 + $0x420] sm:$0xff] }
  0x5d   : > { %2610 = vmatpush1.bf16.msra.mxu0 %v3959_v31  ;;  %v4023_v31 = vcombine.low %v1143_v19, %v1147_v20 }
  0x5e   : > { %2692 = vmatpush1.bf16.msra.mxu1 %v3961_v32  ;;  %2611 = vmatprep.subr.bf16.mxu0 %v3968_v33  ;;  %v4025_v32 = vcombine.low %v1144_v21, %v1148_v22  ;;  %v4032_v33 = vcombine.high %v1151_v27, %v1155_v28 }
  0x5f   : > { %2693 = vmatprep.subr.bf16.mxu1 %v3970_v34  ;;  %v4034_v34 = vcombine.high %v1152_v29, %v1156_v30 }
  0x61   : > { %2612 = vmatpush1.bf16.msra.mxu0 %v3967_v39  ;;  %v4031_v39 = vcombine.low %v1151_v27, %v1155_v28 }
  0x62   : > { %2694 = vmatpush1.bf16.msra.mxu1 %v3969_v40  ;;  %2613 = vmatprep.subr.bf16.mxu0 %v3976_v41  ;;  %v4033_v40 = vcombine.low %v1152_v29, %v1156_v30  ;;  %v4040_v41 = vcombine.high %v1159_v35, %v1163_v36 }
  0x63   : > { %2695 = vmatprep.subr.bf16.mxu1 %v3978_v42  ;;  %v4042_v42 = vcombine.high %v1160_v37, %v1164_v38 }
  0x65   : > { %2614 = vmatpush1.bf16.msra.mxu0 %v3975_v43  ;;  %v4039_v43 = vcombine.low %v1159_v35, %v1163_v36  ;;  %v1039_v36 = vlaneseq }
  0x66   : > { %2696 = vmatpush1.bf16.msra.mxu1 %v3977_v44  ;;  %2615 = vmatprep.subr.bf16.mxu0 %v3984_v47  ;;  %v4041_v44 = vcombine.low %v1160_v37, %v1164_v38  ;;  %v1168_v47 = vld [vmem:[%s4702_s17 + $0x308] sm:$0xff] }
  0x67   : > { %2697 = vmatprep.subr.bf16.mxu1 %v3986_v52  ;;  %v4050_v52 = vcombine.high %v1168_v47, %v1172_v49 }
  0x69   : > { %2616 = vmatpush1.bf16.msra.mxu0 %v3983_v50  ;;  %v4047_v50 = vcombine.low %v1167_v45, %v1171_v46  ;;  %v4989_v46 = vshrl.u32 %v1039_v36, 7 }
  0x6a   : > { %2698 = vmatpush1.bf16.msra.mxu1 %v3985_v51  ;;  %2617 = vmatprep.subr.bf16.mxu0 %v3992_v56  ;;  %v4049_v51 = vcombine.low %v1168_v47, %v1172_v49  ;;  %v4056_v56 = vcombine.high %v1175_v53, %v1179_v54 }
  0x6b   : > { %2699 = vmatprep.subr.bf16.mxu1 %v3994_v60  ;;  %v4058_v60 = vcombine.high %v1176_v55, %v1180_v57 }
  0x6d   : > { %2618 = vmatpush1.bf16.msra.mxu0 %v3991_v58  ;;  %v4055_v58 = vcombine.low %v1175_v53, %v1179_v54 }
  0x6e   : > { %2700 = vmatpush1.bf16.msra.mxu1 %v3993_v59  ;;  %2619 = vmatprep.subr.bf16.mxu0 %v4000_v0  ;;  %v4057_v59 = vcombine.low %v1176_v55, %v1180_v57  ;;  %v4064_v0 = vcombine.high %v1183_v61, %v1187_v62  ;;  %v1207_v62 = vld [vmem:[%s4702_s17 + $0x440] sm:$0xff] }
  0x6f   : > { %2701 = vmatprep.subr.bf16.mxu1 %v4002_v5  ;;  %v1191_v5 = vld [vmem:[%s4702_s17 + $0x3c0] sm:$0xff] }
  0x71   : > { %2620 = vmatpush1.bf16.msra.mxu0 %v3999_v4  ;;  %v4066_v4 = vcombine.high %v1184_v63, %v1188_v1  ;;  %v1211_v63 = vld [vmem:[%s4702_s17 + $0x460] sm:$0xff]  ;;  %v1212_v1 = vld [vmem:[%s4702_s17 + $0x468] sm:$0xff] }
  0x72   : > { %2702 = vmatpush1.bf16.msra.mxu1 %v4001_v8  ;;  %2621 = vmatprep.subr.bf16.mxu0 %v4008_v9  ;;  %v4072_v8 = vcombine.high %v1191_v5, %v1195_v6  ;;  %v1196_v9 = vld [vmem:[%s4702_s17 + $0x3e8] sm:$0xff] }
  0x73   : > { %2703 = vmatprep.subr.bf16.mxu1 %v4010_v10  ;;  %v4071_v10 = vcombine.low %v1191_v5, %v1195_v6  ;;  %v4073_v11 = vcombine.low %v1192_v7, %v1196_v9  ;;  %v4074_v12 = vcombine.high %v1192_v7, %v1196_v9  ;;  %v1215_v5 = vld [vmem:[%s4702_s17 + $0x480] sm:$0xff]  ;;  %v4088_v7 = vcombine.high %v1207_v62, %v1211_v63 }
  0x74   : > { %v1219_v9 = vld [vmem:[%s4702_s17 + $0x4a0] sm:$0xff] }
  0x75   : > { %2622 = vmatpush1.bf16.msra.mxu0 %v4007_v15  ;;  %v4972_v15 = vld [vmem:[%s4702_s17 + $0x408] sm:$0xff] }
  0x76   : > { %2704 = vmatpush1.bf16.msra.mxu1 %v4009_v16  ;;  %2623 = vmatprep.subr.bf16.mxu0 %v4016_v17  ;;  %v4080_v16 = vcombine.high %v4966_v13, %v4969_v14  ;;  %v4977_v17 = vld [vmem:[%s4702_s17 + $0x428] sm:$0xff] }
  0x77   : > { %2705 = vmatprep.subr.bf16.mxu1 %v4018_v18  ;;  %v4079_v18 = vcombine.low %v4966_v13, %v4969_v14  ;;  %v4081_v19 = vcombine.low %v4972_v15, %v4977_v17  ;;  %v4082_v20 = vcombine.high %v4972_v15, %v4977_v17  ;;  %v1227_v13 = vld [vmem:[%s4702_s17 + $0x4e0] sm:$0xff]  ;;  %v1224_v14 = vld [vmem:[%s4702_s17 + $0x4c8] sm:$0xff]  ;;  %v4095_v15 = vcombine.low %v1215_v5, %v1219_v9 }
  0x79   : > { %2624 = vmatpush1.bf16.msra.mxu0 %v4015_v23  ;;  %v3878_v23 = vld [vmem:[%s5451_s2] ss:$0 sm:$0xff] }
  0x7a   : > { %2706 = vmatpush1.bf16.msra.mxu1 %v4017_v24  ;;  %2625 = vmatprep.subr.bf16.mxu0 %v4024_v25 }
  0x7b   : > { %2707 = vmatprep.subr.bf16.mxu1 %v4026_v26 }
  0x7d   : > { %2626 = vmatpush1.bf16.msra.mxu0 %v4023_v31 }
  0x7e   : > { %2708 = vmatpush1.bf16.msra.mxu1 %v4025_v32  ;;  %2627 = vmatprep.subr.bf16.mxu0 %v4032_v33 }
  0x7f   : > { %2709 = vmatprep.subr.bf16.mxu1 %v4034_v34  ;;  %v4631_v34 = vmov 1935823168  }
  0x80   : > { %v1037_v35 = vunpack.c.l.s4 %v4631_v34  ;;  %v1240_v34 = vld [vmem:[%s4702_s17 + $0x548] sm:$0xff] }
  0x81   : > { %2628 = vmatpush1.bf16.msra.mxu0 %v4031_v39  ;;  %v4632_v39 = vmov 1983009808  }
  0x82   : > { %2710 = vmatpush1.bf16.msra.mxu1 %v4033_v40  ;;  %2629 = vmatprep.subr.bf16.mxu0 %v4040_v41  ;;  %v1046_v40 = vunpack.c.l.s4 %v4632_v39  ;;  %v1038_v45 = vunpack.c.0.s8 %v1037_v35  ;;  %v1244_v35 = vld [vmem:[%s4702_s17 + $0x568] sm:$0xff] }
  0x83   : > { %2711 = vmatprep.subr.bf16.mxu1 %v4042_v42 }
  0x84   : > { %v1041_v54 = vsub.s32 %v1038_v45, %v4989_v46 }
  0x85   : > { %2630 = vmatpush1.bf16.msra.mxu0 %v4039_v43 }
  0x86   : > { %2712 = vmatpush1.bf16.msra.mxu1 %v4041_v44  ;;  %2631 = vmatprep.subr.bf16.mxu0 %v4048_v48 }
  0x87   : > { %2713 = vmatprep.subr.bf16.mxu1 %v4050_v52  ;;  %v1047_v52 = vunpack.c.0.s8 %v1046_v40  ;;  %v4122_v40 = vcombine.high %v1240_v34, %v1244_v35 }
  0x89   : > { %2632 = vmatpush1.bf16.msra.mxu0 %v4047_v50 }
  0x8a   : > { %2714 = vmatpush1.bf16.msra.mxu1 %v4049_v51  ;;  %2633 = vmatprep.subr.bf16.mxu0 %v4056_v56  ;;  %v4993_v56 = vsub.s32 %v1047_v52, %v4989_v46  ;;  %v1256_v52 = vld [vmem:[%s4702_s17 + $0x5c8] sm:$0xff] }
  0x8b   : > { %2715 = vmatprep.subr.bf16.mxu1 %v4058_v60 }
  0x8d   : > { %2634 = vmatpush1.bf16.msra.mxu0 %v4055_v58 }
  0x8e   : > { %2716 = vmatpush1.bf16.msra.mxu1 %v4057_v59  ;;  %2635 = vmatprep.subr.bf16.mxu0 %v4064_v0  ;;  %v1208_v0 = vld [vmem:[%s4702_s17 + $0x448] sm:$0xff] }
  0x8f   : > { %2717 = vmatprep.subr.bf16.mxu1 %v4066_v4 }
  0x91   : > { %2636 = vmatpush1.bf16.msra.mxu0 %v4063_v2 }
  0x92   : > { %2718 = vmatpush1.bf16.msra.mxu1 %v4065_v3  ;;  %2637 = vmatprep.subr.bf16.mxu0 %v4072_v8  ;;  %v4090_v8 = vcombine.high %v1208_v0, %v1212_v1 }
  0x93   : > { %2719 = vmatprep.subr.bf16.mxu1 %v4074_v12  ;;  %v4087_v12 = vcombine.low %v1207_v62, %v1211_v63  ;;  %v1264_v62 = vld [vmem:[%s4702_s17 + $0x608] sm:$0xff] }
  0x94   : > { %v1268_v63 = vld [vmem:[%s4702_s17 + $0x628] sm:$0xff] }
  0x95   : > { %2638 = vmatpush1.bf16.msra.mxu0 %v4071_v10  ;;  %v1216_v10 = vld [vmem:[%s4702_s17 + $0x488] sm:$0xff] }
  0x96   : > { %2720 = vmatpush1.bf16.msra.mxu1 %v4073_v11  ;;  %2648 = vmatprep.subr.bf16.mxu0 %v4080_v16  ;;  %v1220_v11 = vld [vmem:[%s4702_s17 + $0x4a8] sm:$0xff]  ;;  %v4089_v16 = vcombine.low %v1208_v0, %v1212_v1 }
  0x97   : > { %2730 = vmatprep.subr.bf16.mxu1 %v4082_v20  ;;  %v4096_v20 = vcombine.high %v1215_v5, %v1219_v9  ;;  %v4097_v17 = vcombine.low %v1216_v10, %v1220_v11  ;;  %v4146_v5 = vcombine.high %v1264_v62, %v1268_v63  ;;  %v1272_v9 = vld [vmem:[%s4702_s17 + $0x648] sm:$0xff] }
 0x10b   : > { %v4293_v21 = vpop.f32.mrb[0].mxu0 }
 0x10c   : > { %v4315_v22 = vpop.f32.mrb[0].mxu1  ;;  %v4294_v24 = vpop.f32.mrb[1].mxu0 }
 0x10d   : > { %v4316_v25 = vpop.f32.mrb[1].mxu1  ;;  %v4295_v26 = vadd.f32 %v4294_v24, %v4293_v21  ;;  %v4296_v28 = vpop.f32.mrb[2].mxu0  ;;  %v4098_v21 = vcombine.high %v1216_v10, %v1220_v11  ;;  %v1231_v24 = vld [vmem:[%s4702_s17 + $0x500] sm:$0xff]  ;;  %v1276_v10 = vld [vmem:[%s4702_s17 + $0x668] sm:$0xff] }
 0x10e   : > { %v4317_v27 = vadd.f32 %v4316_v25, %v4315_v22  ;;  %v4318_v29 = vpop.f32.mrb[2].mxu1  ;;  %v4297_v30 = vpop.f32.mrb[3].mxu0  ;;  %v1223_v22 = vld [vmem:[%s4702_s17 + $0x4c0] sm:$0xff] }
 0x10f   : > { %v4319_v31 = vpop.f32.mrb[3].mxu1  ;;  %v910_v32 = vadd.f32 %v4295_v26, %v3878_v23  ;;  %v1235_v25 = vld [vmem:[%s4702_s17 + $0x520] sm:$0xff]  ;;  %v1232_v26 = vld [vmem:[%s4702_s17 + $0x508] sm:$0xff]  ;;  %v4103_v28 = vcombine.low %v1223_v22, %v1227_v13 }
 0x110   : > { %v4112_v30 = vcombine.high %v1231_v24, %v1235_v25 }
 0x111   : > { %v950_v33 = vadd.f32 %v4317_v27, %v910_v32  ;;  %v1236_v27 = vld [vmem:[%s4702_s17 + $0x528] sm:$0xff]  ;;  %v1239_v32 = vld [vmem:[%s4702_s17 + $0x540] sm:$0xff] }
 0x112   : > { %v4114_v31 = vcombine.high %v1232_v26, %v1236_v27 }
 0x12b   : > { %v4337_v37 = vpop.f32.mrb[4].mxu0 }
 0x12c   : > { %v4359_v38 = vpop.f32.mrb[4].mxu1  ;;  %v4338_v41 = vpop.f32.mrb[5].mxu0 }
 0x12d   : > { %v4360_v42 = vpop.f32.mrb[5].mxu1  ;;  %v4339_v43 = vadd.f32 %v4338_v41, %v4337_v37  ;;  %v4340_v47 = vpop.f32.mrb[6].mxu0  ;;  %v4111_v37 = vcombine.low %v1231_v24, %v1235_v25  ;;  %v1247_v41 = vld [vmem:[%s4702_s17 + $0x580] sm:$0xff]  ;;  %v1288_v25 = vld [vmem:[%s4702_s17 + $0x6c8] sm:$0xff] }
 0x12e   : > { %v4361_v44 = vadd.f32 %v4360_v42, %v4359_v38  ;;  %v4362_v48 = vpop.f32.mrb[6].mxu1  ;;  %v4341_v49 = vpop.f32.mrb[7].mxu0  ;;  %v4113_v38 = vcombine.low %v1232_v26, %v1236_v27  ;;  %v1251_v42 = vld [vmem:[%s4702_s17 + $0x5a0] sm:$0xff]  ;;  %v4121_v47 = vcombine.low %v1240_v34, %v1244_v35  ;;  %v1292_v26 = vld [vmem:[%s4702_s17 + $0x6e8] sm:$0xff] }
 0x12f   : > { %v4363_v50 = vpop.f32.mrb[7].mxu1  ;;  %v990_v51 = vadd.f32 %v4339_v43, %v950_v33  ;;  %v1243_v33 = vld [vmem:[%s4702_s17 + $0x560] sm:$0xff]  ;;  %v1248_v43 = vld [vmem:[%s4702_s17 + $0x588] sm:$0xff]  ;;  %v4128_v48 = vcombine.high %v1247_v41, %v1251_v42 }
 0x130   : > { %v4120_v39 = vcombine.high %v1239_v32, %v1243_v33  ;;  %v4119_v45 = vcombine.low %v1239_v32, %v1243_v33  ;;  %v1255_v50 = vld [vmem:[%s4702_s17 + $0x5c0] sm:$0xff]  ;;  %v1296_v33 = vld [vmem:[%s4702_s17 + $0x708] sm:$0xff] }
 0x131   : > { %v1030_v53 = vadd.f32 %v4361_v44, %v990_v51  ;;  %v1252_v44 = vld [vmem:[%s4702_s17 + $0x5a8] sm:$0xff]  ;;  %v1259_v51 = vld [vmem:[%s4702_s17 + $0x5e0] sm:$0xff] }
 0x132   : > { %v4130_v49 = vcombine.high %v1248_v43, %v1252_v44  ;;  %v4135_v0 = vcombine.low %v1255_v50, %v1259_v51  ;;  %v1291_v24 = vld [vmem:[%s4702_s17 + $0x6e0] sm:$0xff]  ;;  %v1300_v34 = vld [vmem:[%s4702_s17 + $0x728] sm:$0xff] }
 0x133   : > { %v1035_v55 = vmax.f32 %v1030_v53, 0.0  ;;  %v1260_v53 = vld [vmem:[%s4702_s17 + $0x5e8] sm:$0xff]  ;;  %v1299_v32 = vld [vmem:[%s4702_s17 + $0x720] sm:$0xff] }
 0x134   : > { %v4137_v1 = vcombine.low %v1256_v52, %v1260_v53 }
 0x135   : > { %v1042_v57 = vrot.slane %v1035_v55, %v1041_v54  ;;  %v4127_v54 = vcombine.low %v1247_v41, %v1251_v42  ;;  %v4129_v55 = vcombine.low %v1248_v43, %v1252_v44  ;;  %v1307_v41 = vld [vmem:[%s4702_s17 + $0x760] sm:$0xff]  ;;  %v1304_v42 = vld [vmem:[%s4702_s17 + $0x748] sm:$0xff] }
 0x136   : > { %v1308_v43 = vld [vmem:[%s4702_s17 + $0x768] sm:$0xff] }
 0x137   : > { %v1044_v58 = vcombine.high %v1042_v57, %v1042_v57  ;;  %v1051_v59 = vrot.slane %v1042_v57, %v4993_v56  ;;  %v4136_v57 = vcombine.high %v1255_v50, %v1259_v51  ;;  %v1315_v50 = vld [vmem:[%s4702_s17 + $0x7a0] sm:$0xff]  ;;  %v1312_v51 = vld [vmem:[%s4702_s17 + $0x788] sm:$0xff] }
 0x139   : > { %v4997_v60 = vrot.slane %v1044_v58, %v4993_v56  ;;  %v1059_v61 = vcombine.high %v1051_v59, %v1051_v59  ;;  %v5007_v4 = vpack.c.bf16 %v1051_v59, %v1051_v59  ;;  %v4138_v58 = vcombine.high %v1256_v52, %v1260_v53  ;;  %v1263_v59 = vld [vmem:[%s4702_s17 + $0x600] sm:$0xff]  ;;  %v1316_v52 = vld [vmem:[%s4702_s17 + $0x7a8] sm:$0xff] }
 0x13b   : > { %v5003_v2 = vpack.c.bf16 %v1059_v61, %v1059_v61  ;;  %v1060_v3 = vcombine.high %v4997_v60, %v4997_v60  ;;  %v1267_v61 = vld [vmem:[%s4702_s17 + $0x620] sm:$0xff] }
 0x13c   : > { %v4143_v11 = vcombine.low %v1263_v59, %v1267_v61 }
 0x13d   : > { %2639 = vmatprep.mubr.bf16.mxu0 %v5003_v2  ;;  %2721 = vmatprep.mubr.bf16.mxu1 %v5003_v2  ;;  %v5012_v6 = vpack.c.bf16 %v1060_v3, %v1060_v3  ;;  %v4144_v3 = vcombine.high %v1263_v59, %v1267_v61  ;;  %v1323_v59 = vld [vmem:[%s4702_s17 + $0x7e0] sm:$0xff]  ;;  %v1320_v61 = vld [vmem:[%s4702_s17 + $0x7c8] sm:$0xff] }
 0x13e   : > { %2640 = vmatmul.mubr.bf16.vlgmr.msra.gmra.mrb[8].mxu0 %v5007_v4  ;;  %2722 = vmatmul.mubr.bf16.vlgmr.msra.gmra.mrb[8].mxu1 %v5007_v4 }
 0x13f   : > { %2649 = vmatpush1.bf16.msra.mxu0 %v4079_v18  ;;  %2731 = vmatpush1.bf16.msra.mxu1 %v4081_v19  ;;  %v1228_v18 = vld [vmem:[%s4702_s17 + $0x4e8] sm:$0xff]  ;;  %v4104_v19 = vcombine.high %v1223_v22, %v1227_v13  ;;  %v1283_v22 = vld [vmem:[%s4702_s17 + $0x6a0] sm:$0xff] }
 0x140   : > { %2680 = vmatprep.mubr.bf16.mxu0 %v5012_v6  ;;  %2762 = vmatprep.mubr.bf16.mxu1 %v5012_v6  ;;  %v4106_v23 = vcombine.high %v1224_v14, %v1228_v18  ;;  %v4105_v29 = vcombine.low %v1224_v14, %v1228_v18  ;;  %v1280_v13 = vld [vmem:[%s4702_s17 + $0x688] sm:$0xff] }
 0x141   : > { %2650 = vmatprep.subr.bf16.mxu0 %v4088_v7  ;;  %2732 = vmatprep.subr.bf16.mxu1 %v4090_v8  ;;  %v1271_v7 = vld [vmem:[%s4702_s17 + $0x640] sm:$0xff]  ;;  %v1284_v14 = vld [vmem:[%s4702_s17 + $0x6a8] sm:$0xff] }
 0x142   : > { %v1275_v8 = vld [vmem:[%s4702_s17 + $0x660] sm:$0xff] }
 0x143   : > { %2651 = vmatpush1.bf16.msra.mxu0 %v4087_v12  ;;  %2733 = vmatpush1.bf16.msra.mxu1 %v4089_v16  ;;  %v4145_v12 = vcombine.low %v1264_v62, %v1268_v63  ;;  %v4152_v16 = vcombine.high %v1271_v7, %v1275_v8  ;;  %v4151_v18 = vcombine.low %v1271_v7, %v1275_v8  ;;  %v1324_v62 = vld [vmem:[%s4702_s17 + $0x7e8] sm:$0xff]  ;;  %v1077_v7 = vld [vmem:[%s4702_s17 + $0x30] sm:$0xff]  ;;  %v1074_v8 = vld [vmem:[%s4702_s17 + $0x18] sm:$0xff] }
 0x144   : > { %2652 = vmatprep.subr.bf16.mxu0 %v4096_v20  ;;  %2734 = vmatprep.subr.bf16.mxu1 %v4098_v21  ;;  %v4154_v20 = vcombine.high %v1272_v9, %v1276_v10  ;;  %v1279_v21 = vld [vmem:[%s4702_s17 + $0x680] sm:$0xff] }
 0x145   : > { %v4159_v27 = vcombine.low %v1279_v21, %v1283_v22 }
 0x147   : > { %2653 = vmatpush1.bf16.msra.mxu0 %v4095_v15  ;;  %2735 = vmatpush1.bf16.msra.mxu1 %v4097_v17  ;;  %v4153_v15 = vcombine.low %v1272_v9, %v1276_v10  ;;  %v4160_v17 = vcombine.high %v1279_v21, %v1283_v22  ;;  %v1078_v9 = vld [vmem:[%s4702_s17 + $0x38] sm:$0xff]  ;;  %v1085_v21 = vld [vmem:[%s4702_s17 + $0x70] sm:$0xff] }
 0x148   : > { %2654 = vmatprep.subr.bf16.mxu0 %v4104_v19  ;;  %2736 = vmatprep.subr.bf16.mxu1 %v4106_v23  ;;  %v4162_v19 = vcombine.high %v1280_v13, %v1284_v14  ;;  %v1287_v23 = vld [vmem:[%s4702_s17 + $0x6c0] sm:$0xff]  ;;  %v1082_v22 = vld [vmem:[%s4702_s17 + $0x58] sm:$0xff] }
 0x149   : > { %v4167_v35 = vcombine.low %v1287_v23, %v1291_v24 }
 0x14b   : > { %2655 = vmatpush1.bf16.msra.mxu0 %v4103_v28  ;;  %2737 = vmatpush1.bf16.msra.mxu1 %v4105_v29  ;;  %v4161_v28 = vcombine.low %v1280_v13, %v1284_v14  ;;  %v4168_v29 = vcombine.high %v1287_v23, %v1291_v24  ;;  %v1086_v13 = vld [vmem:[%s4702_s17 + $0x78] sm:$0xff]  ;;  %v1089_v23 = vld [vmem:[%s4702_s17 + $0x90] sm:$0xff] }
 0x14c   : > { %2656 = vmatprep.subr.bf16.mxu0 %v4112_v30  ;;  %2738 = vmatprep.subr.bf16.mxu1 %v4114_v31  ;;  %v4170_v30 = vcombine.high %v1288_v25, %v1292_v26  ;;  %v1295_v31 = vld [vmem:[%s4702_s17 + $0x700] sm:$0xff]  ;;  %v1093_v24 = vld [vmem:[%s4702_s17 + $0xb0] sm:$0xff] }
 0x14d   : > { %v4175_v44 = vcombine.low %v1295_v31, %v1299_v32 }
 0x14f   : > { %2657 = vmatpush1.bf16.msra.mxu0 %v4111_v37  ;;  %2739 = vmatpush1.bf16.msra.mxu1 %v4113_v38  ;;  %v4169_v37 = vcombine.low %v1288_v25, %v1292_v26  ;;  %v4176_v38 = vcombine.high %v1295_v31, %v1299_v32  ;;  %v1090_v25 = vld [vmem:[%s4702_s17 + $0x98] sm:$0xff]  ;;  %v1101_v31 = vld [vmem:[%s4702_s17 + $0xf0] sm:$0xff] }
 0x150   : > { %2658 = vmatprep.subr.bf16.mxu0 %v4120_v39  ;;  %2740 = vmatprep.subr.bf16.mxu1 %v4122_v40  ;;  %v4178_v39 = vcombine.high %v1296_v33, %v1300_v34  ;;  %v1303_v40 = vld [vmem:[%s4702_s17 + $0x740] sm:$0xff]  ;;  %v1094_v26 = vld [vmem:[%s4702_s17 + $0xb8] sm:$0xff] }
 0x151   : > { %v4183_v53 = vcombine.low %v1303_v40, %v1307_v41  ;;  %v1098_v32 = vld [vmem:[%s4702_s17 + $0xd8] sm:$0xff] }
 0x153   : > { %2659 = vmatpush1.bf16.msra.mxu0 %v4119_v45  ;;  %2741 = vmatpush1.bf16.msra.mxu1 %v4121_v47  ;;  %v4177_v45 = vcombine.low %v1296_v33, %v1300_v34  ;;  %v4184_v47 = vcombine.high %v1303_v40, %v1307_v41  ;;  %v1102_v33 = vld [vmem:[%s4702_s17 + $0xf8] sm:$0xff]  ;;  %v3971_v34 = vcombine.low %v1089_v23, %v1093_v24 }
 0x154   : > { %2660 = vmatprep.subr.bf16.mxu0 %v4128_v48  ;;  %2742 = vmatprep.subr.bf16.mxu1 %v4130_v49  ;;  %v4186_v48 = vcombine.high %v1304_v42, %v1308_v43  ;;  %v1311_v49 = vld [vmem:[%s4702_s17 + $0x780] sm:$0xff]  ;;  %v1106_v40 = vld [vmem:[%s4702_s17 + $0x118] sm:$0xff] }
 0x155   : > { %v4191_v63 = vcombine.low %v1311_v49, %v1315_v50  ;;  %v1110_v41 = vld [vmem:[%s4702_s17 + $0x138] sm:$0xff] }
 0x157   : > { %2661 = vmatpush1.bf16.msra.mxu0 %v4127_v54  ;;  %2743 = vmatpush1.bf16.msra.mxu1 %v4129_v55  ;;  %v4185_v54 = vcombine.low %v1304_v42, %v1308_v43  ;;  %v4192_v55 = vcombine.high %v1311_v49, %v1315_v50  ;;  %v3981_v43 = vcombine.low %v1098_v32, %v1102_v33  ;;  %v1114_v49 = vld [vmem:[%s4702_s17 + $0x158] sm:$0xff] }
 0x158   : > { %2662 = vmatprep.subr.bf16.mxu0 %v4136_v57  ;;  %2744 = vmatprep.subr.bf16.mxu1 %v4138_v58  ;;  %v4194_v57 = vcombine.high %v1312_v51, %v1316_v52  ;;  %v1319_v58 = vld [vmem:[%s4702_s17 + $0x7c0] sm:$0xff]  ;;  %v1118_v50 = vld [vmem:[%s4702_s17 + $0x178] sm:$0xff] }
 0x159   : > { %v4199_v10 = vcombine.low %v1319_v58, %v1323_v59 }
 0x15b   : > { %2663 = vmatpush1.bf16.msra.mxu0 %v4135_v0  ;;  %2745 = vmatpush1.bf16.msra.mxu1 %v4137_v1  ;;  %v4193_v0 = vcombine.low %v1312_v51, %v1316_v52  ;;  %v4200_v1 = vcombine.high %v1319_v58, %v1323_v59  ;;  %v3989_v52 = vcombine.low %v1106_v40, %v1110_v41  ;;  %v1122_v58 = vld [vmem:[%s4702_s17 + $0x198] sm:$0xff] }
 0x15c   : > { %2664 = vmatprep.subr.bf16.mxu0 %v4144_v3  ;;  %2746 = vmatprep.subr.bf16.mxu1 %v4146_v5  ;;  %v4202_v3 = vcombine.high %v1320_v61, %v1324_v62  ;;  %v1073_v5 = vld [vmem:[%s4702_s17 + $0x10] sm:$0xff]  ;;  %v1126_v59 = vld [vmem:[%s4702_s17 + $0x1b8] sm:$0xff] }
 0x15d   : > { %v3955_v14 = vcombine.low %v1073_v5, %v1077_v7 }
 0x15f   : > { %2665 = vmatpush1.bf16.msra.mxu0 %v4143_v11  ;;  %2747 = vmatpush1.bf16.msra.mxu1 %v4145_v12  ;;  %v4201_v11 = vcombine.low %v1320_v61, %v1324_v62  ;;  %v3956_v12 = vcombine.high %v1073_v5, %v1077_v7  ;;  %v3997_v62 = vcombine.low %v1114_v49, %v1118_v50  ;;  %v1130_v5 = vld [vmem:[%s4702_s17 + $0x1d8] sm:$0xff] }
 0x160   : > { %2666 = vmatprep.subr.bf16.mxu0 %v4152_v16  ;;  %2748 = vmatprep.subr.bf16.mxu1 %v4154_v20  ;;  %v3958_v16 = vcombine.high %v1074_v8, %v1078_v9  ;;  %v1081_v20 = vld [vmem:[%s4702_s17 + $0x50] sm:$0xff]  ;;  %v1134_v7 = vld [vmem:[%s4702_s17 + $0x1f8] sm:$0xff] }
 0x163   : > { %2667 = vmatpush1.bf16.msra.mxu0 %v4151_v18  ;;  %2749 = vmatpush1.bf16.msra.mxu1 %v4153_v15  ;;  %v5089_v18 = vpack.c.bf16 %v4997_v60, %v4997_v60  ;;  %v3957_v15 = vcombine.low %v1074_v8, %v1078_v9  ;;  %v3963_v60 = vcombine.low %v1081_v20, %v1085_v21 }
 0x164   : > { %2668 = vmatprep.subr.bf16.mxu0 %v4160_v17  ;;  %2750 = vmatprep.subr.bf16.mxu1 %v4162_v19  ;;  %v3964_v17 = vcombine.high %v1081_v20, %v1085_v21  ;;  %v3966_v19 = vcombine.high %v1082_v22, %v1086_v13  ;;  %v4005_v9 = vcombine.low %v1122_v58, %v1126_v59  ;;  %v1138_v20 = vld [vmem:[%s4702_s17 + $0x218] sm:$0xff] }
 0x165   : > { %v1142_v21 = vld [vmem:[%s4702_s17 + $0x238] sm:$0xff] }
 0x167   : > { %2669 = vmatpush1.bf16.msra.mxu0 %v4159_v27  ;;  %2751 = vmatpush1.bf16.msra.mxu1 %v4161_v28  ;;  %v3965_v27 = vcombine.low %v1082_v22, %v1086_v13  ;;  %v3972_v28 = vcombine.high %v1089_v23, %v1093_v24  ;;  %v4013_v13 = vcombine.low %v1130_v5, %v1134_v7  ;;  %v1146_v23 = vld [vmem:[%s4702_s17 + $0x258] sm:$0xff] }
 0x168   : > { %2670 = vmatprep.subr.bf16.mxu0 %v4168_v29  ;;  %2752 = vmatprep.subr.bf16.mxu1 %v4170_v30  ;;  %v3974_v29 = vcombine.high %v1090_v25, %v1094_v26  ;;  %v1097_v30 = vld [vmem:[%s4702_s17 + $0xd0] sm:$0xff]  ;;  %v1150_v24 = vld [vmem:[%s4702_s17 + $0x278] sm:$0xff] }
 0x169   : > { %v3979_v42 = vcombine.low %v1097_v30, %v1101_v31 }
 0x16b   : > { %2671 = vmatpush1.bf16.msra.mxu0 %v4167_v35  ;;  %2753 = vmatpush1.bf16.msra.mxu1 %v4169_v37  ;;  %v3973_v35 = vcombine.low %v1090_v25, %v1094_v26  ;;  %v3982_v37 = vcombine.high %v1098_v32, %v1102_v33  ;;  %v4021_v26 = vcombine.low %v1138_v20, %v1142_v21 }
 0x16c   : > { %2672 = vmatprep.subr.bf16.mxu0 %v4176_v38  ;;  %2754 = vmatprep.subr.bf16.mxu1 %v4178_v39  ;;  %v1105_v38 = vld [vmem:[%s4702_s17 + $0x110] sm:$0xff]  ;;  %v4029_v33 = vcombine.low %v1146_v23, %v1150_v24 }
 0x16d   : > { %v1109_v39 = vld [vmem:[%s4702_s17 + $0x130] sm:$0xff] }
 0x16e   : > { %v3987_v51 = vcombine.low %v1105_v38, %v1109_v39 }
 0x16f   : > { %2673 = vmatpush1.bf16.msra.mxu0 %v4175_v44  ;;  %2755 = vmatpush1.bf16.msra.mxu1 %v4177_v45  ;;  %v3988_v44 = vcombine.high %v1105_v38, %v1109_v39  ;;  %v3990_v45 = vcombine.high %v1106_v40, %v1110_v41  ;;  %v1162_v38 = vld [vmem:[%s4702_s17 + $0x2d8] sm:$0xff] }
 0x170   : > { %2674 = vmatprep.subr.bf16.mxu0 %v4184_v47  ;;  %2756 = vmatprep.subr.bf16.mxu1 %v4186_v48  ;;  %v1113_v47 = vld [vmem:[%s4702_s17 + $0x150] sm:$0xff]  ;;  %v1166_v39 = vld [vmem:[%s4702_s17 + $0x2f8] sm:$0xff] }
 0x171   : > { %v1117_v48 = vld [vmem:[%s4702_s17 + $0x170] sm:$0xff] }
 0x172   : > { %v3995_v61 = vcombine.low %v1113_v47, %v1117_v48 }
 0x173   : > { %2675 = vmatpush1.bf16.msra.mxu0 %v4183_v53  ;;  %2757 = vmatpush1.bf16.msra.mxu1 %v4185_v54  ;;  %v3996_v53 = vcombine.high %v1113_v47, %v1117_v48  ;;  %v3998_v54 = vcombine.high %v1114_v49, %v1118_v50  ;;  %v1170_v47 = vld [vmem:[%s4702_s17 + $0x318] sm:$0xff]  ;;  %v4045_v50 = vcombine.low %v1162_v38, %v1166_v39 }
 0x174   : > { %2676 = vmatprep.subr.bf16.mxu0 %v4192_v55  ;;  %2758 = vmatprep.subr.bf16.mxu1 %v4194_v57  ;;  %v1121_v55 = vld [vmem:[%s4702_s17 + $0x190] sm:$0xff]  ;;  %v1174_v48 = vld [vmem:[%s4702_s17 + $0x338] sm:$0xff] }
 0x175   : > { %v1125_v57 = vld [vmem:[%s4702_s17 + $0x1b0] sm:$0xff] }
 0x176   : > { %v4003_v8 = vcombine.low %v1121_v55, %v1125_v57 }
 0x177   : > { %2677 = vmatpush1.bf16.msra.mxu0 %v4191_v63  ;;  %2759 = vmatpush1.bf16.msra.mxu1 %v4193_v0  ;;  %v4004_v63 = vcombine.high %v1121_v55, %v1125_v57  ;;  %v4006_v0 = vcombine.high %v1122_v58, %v1126_v59  ;;  %v1178_v55 = vld [vmem:[%s4702_s17 + $0x358] sm:$0xff]  ;;  %v4053_v59 = vcombine.low %v1170_v47, %v1174_v48 }
 0x178   : > { %2678 = vmatprep.subr.bf16.mxu0 %v4200_v1  ;;  %2760 = vmatprep.subr.bf16.mxu1 %v4202_v3  ;;  %v1129_v1 = vld [vmem:[%s4702_s17 + $0x1d0] sm:$0xff]  ;;  %v1182_v57 = vld [vmem:[%s4702_s17 + $0x378] sm:$0xff] }
 0x179   : > { %v1133_v3 = vld [vmem:[%s4702_s17 + $0x1f0] sm:$0xff] }
 0x17a   : > { %v4011_v22 = vcombine.low %v1129_v1, %v1133_v3 }
 0x17b   : > { %2679 = vmatpush1.bf16.msra.mxu0 %v4199_v10  ;;  %2761 = vmatpush1.bf16.msra.mxu1 %v4201_v11  ;;  %v4012_v10 = vcombine.high %v1129_v1, %v1133_v3  ;;  %v4014_v11 = vcombine.high %v1130_v5, %v1134_v7  ;;  %v1186_v1 = vld [vmem:[%s4702_s17 + $0x398] sm:$0xff]  ;;  %v4061_v7 = vcombine.low %v1178_v55, %v1182_v57 }
 0x17c   : > { %2771 = vmatprep.subr.bf16.mxu0 %v3956_v12  ;;  %2853 = vmatprep.subr.bf16.mxu1 %v3958_v16  ;;  %v1137_v12 = vld [vmem:[%s4702_s17 + $0x210] sm:$0xff]  ;;  %v1190_v3 = vld [vmem:[%s4702_s17 + $0x3b8] sm:$0xff] }
 0x17d   : > { %v1141_v16 = vld [vmem:[%s4702_s17 + $0x230] sm:$0xff] }
 0x17e   : > { %2681 = vmatmul.mubr.bf16.vlgmr.msra.gmra.mrb[8].mxu0 %v5089_v18  ;;  %2763 = vmatmul.mubr.bf16.vlgmr.msra.gmra.mrb[8].mxu1 %v5089_v18  ;;  %v4019_v25 = vcombine.low %v1137_v12, %v1141_v16 }
 0x17f   : > { %2772 = vmatpush1.bf16.msra.mxu0 %v3955_v14  ;;  %2803 = vmatprep.mubr.bf16.mxu0 %v5003_v2  ;;  %v4020_v14 = vcombine.high %v1137_v12, %v1141_v16  ;;  %v1194_v12 = vld [vmem:[%s4702_s17 + $0x3d8] sm:$0xff] }
 0x180   : > { %2854 = vmatpush1.bf16.msra.mxu1 %v3957_v15  ;;  %2885 = vmatprep.mubr.bf16.mxu1 %v5003_v2  ;;  %v3980_v2 = vcombine.high %v1097_v30, %v1101_v31  ;;  %v4022_v15 = vcombine.high %v1138_v20, %v1142_v21  ;;  %v1154_v30 = vld [vmem:[%s4702_s17 + $0x298] sm:$0xff]  ;;  %v4069_v21 = vcombine.low %v1186_v1, %v1190_v3 }
 0x181   : > { %2773 = vmatprep.subr.bf16.mxu0 %v3964_v17  ;;  %2855 = vmatprep.subr.bf16.mxu1 %v3966_v19  ;;  %v1145_v17 = vld [vmem:[%s4702_s17 + $0x250] sm:$0xff]  ;;  %v1158_v31 = vld [vmem:[%s4702_s17 + $0x2b8] sm:$0xff] }
 0x182   : > { %v1149_v19 = vld [vmem:[%s4702_s17 + $0x270] sm:$0xff]  ;;  %v4037_v41 = vcombine.low %v1154_v30, %v1158_v31  ;;  %v1198_v16 = vld [vmem:[%s4702_s17 + $0x3f8] sm:$0xff] }
 0x183   : > { %2774 = vmatpush1.bf16.msra.mxu0 %v3963_v60  ;;  %v4028_v60 = vcombine.high %v1145_v17, %v1149_v19  ;;  %v4027_v32 = vcombine.low %v1145_v17, %v1149_v19  ;;  %v1202_v17 = vld [vmem:[%s4702_s17 + $0x418] sm:$0xff] }
 0x184   : > { %2856 = vmatpush1.bf16.msra.mxu1 %v3965_v27  ;;  %2775 = vmatprep.subr.bf16.mxu0 %v3972_v28  ;;  %v4030_v27 = vcombine.high %v1146_v23, %v1150_v24  ;;  %v1153_v28 = vld [vmem:[%s4702_s17 + $0x290] sm:$0xff]  ;;  %v1206_v19 = vld [vmem:[%s4702_s17 + $0x438] sm:$0xff]  ;;  %v4077_v24 = vcombine.low %v1194_v12, %v1198_v16 }
 0x185   : > { %2857 = vmatprep.subr.bf16.mxu1 %v3974_v29  ;;  %v1157_v29 = vld [vmem:[%s4702_s17 + $0x2b0] sm:$0xff] }
 0x186   : > { %v4035_v40 = vcombine.low %v1153_v28, %v1157_v29 }
 0x187   : > { %2776 = vmatpush1.bf16.msra.mxu0 %v3971_v34  ;;  %v4036_v34 = vcombine.high %v1153_v28, %v1157_v29  ;;  %v1210_v29 = vld [vmem:[%s4702_s17 + $0x458] sm:$0xff] }
 0x188   : > { %2858 = vmatpush1.bf16.msra.mxu1 %v3973_v35  ;;  %2777 = vmatprep.subr.bf16.mxu0 %v3980_v2  ;;  %v4038_v35 = vcombine.high %v1154_v30, %v1158_v31  ;;  %v1161_v2 = vld [vmem:[%s4702_s17 + $0x2d0] sm:$0xff]  ;;  %v1214_v30 = vld [vmem:[%s4702_s17 + $0x478] sm:$0xff]  ;;  %v4085_v31 = vcombine.low %v1202_v17, %v1206_v19 }
 0x189   : > { %2859 = vmatprep.subr.bf16.mxu1 %v3982_v37  ;;  %v1165_v37 = vld [vmem:[%s4702_s17 + $0x2f0] sm:$0xff] }
 0x18a   : > { %v4043_v49 = vcombine.low %v1161_v2, %v1165_v37 }
 0x18b   : > { %2778 = vmatpush1.bf16.msra.mxu0 %v3979_v42  ;;  %v4044_v42 = vcombine.high %v1161_v2, %v1165_v37  ;;  %v1218_v2 = vld [vmem:[%s4702_s17 + $0x498] sm:$0xff] }
 0x18c   : > { %2860 = vmatpush1.bf16.msra.mxu1 %v3981_v43  ;;  %2779 = vmatprep.subr.bf16.mxu0 %v3988_v44  ;;  %v4046_v43 = vcombine.high %v1162_v38, %v1166_v39  ;;  %v1169_v44 = vld [vmem:[%s4702_s17 + $0x310] sm:$0xff]  ;;  %v1222_v37 = vld [vmem:[%s4702_s17 + $0x4b8] sm:$0xff]  ;;  %v4093_v39 = vcombine.low %v1210_v29, %v1214_v30 }
 0x18d   : > { %2861 = vmatprep.subr.bf16.mxu1 %v3990_v45  ;;  %v1173_v45 = vld [vmem:[%s4702_s17 + $0x330] sm:$0xff] }
 0x18e   : > { %v4051_v58 = vcombine.low %v1169_v44, %v1173_v45 }
 0x18f   : > { %2780 = vmatpush1.bf16.msra.mxu0 %v3987_v51  ;;  %v4052_v51 = vcombine.high %v1169_v44, %v1173_v45  ;;  %v1226_v44 = vld [vmem:[%s4702_s17 + $0x4d8] sm:$0xff] }
 0x190   : > { %2862 = vmatpush1.bf16.msra.mxu1 %v3989_v52  ;;  %2781 = vmatprep.subr.bf16.mxu0 %v3996_v53  ;;  %v4054_v52 = vcombine.high %v1170_v47, %v1174_v48  ;;  %v1177_v53 = vld [vmem:[%s4702_s17 + $0x350] sm:$0xff]  ;;  %v4101_v47 = vcombine.low %v1218_v2, %v1222_v37 }
 0x191   : > { %2863 = vmatprep.subr.bf16.mxu1 %v3998_v54  ;;  %v1181_v54 = vld [vmem:[%s4702_s17 + $0x370] sm:$0xff] }
 0x192   : > { %v4059_v5 = vcombine.low %v1177_v53, %v1181_v54 }
 0x193   : > { %2782 = vmatpush1.bf16.msra.mxu0 %v3995_v61  ;;  %v4060_v61 = vcombine.high %v1177_v53, %v1181_v54 }
 0x194   : > { %2864 = vmatpush1.bf16.msra.mxu1 %v3997_v62  ;;  %2783 = vmatprep.subr.bf16.mxu0 %v4004_v63  ;;  %v4062_v62 = vcombine.high %v1178_v55, %v1182_v57  ;;  %v1185_v63 = vld [vmem:[%s4702_s17 + $0x390] sm:$0xff] }
 0x195   : > { %2865 = vmatprep.subr.bf16.mxu1 %v4006_v0  ;;  %v1189_v0 = vld [vmem:[%s4702_s17 + $0x3b0] sm:$0xff] }
 0x196   : > { %v4067_v20 = vcombine.low %v1185_v63, %v1189_v0 }
 0x197   : > { %2784 = vmatpush1.bf16.msra.mxu0 %v4003_v8  ;;  %v4068_v8 = vcombine.high %v1185_v63, %v1189_v0 }
 0x198   : > { %2866 = vmatpush1.bf16.msra.mxu1 %v4005_v9  ;;  %2785 = vmatprep.subr.bf16.mxu0 %v4012_v10  ;;  %v4070_v9 = vcombine.high %v1186_v1, %v1190_v3  ;;  %v1193_v10 = vld [vmem:[%s4702_s17 + $0x3d0] sm:$0xff] }
 0x199   : > { %2867 = vmatprep.subr.bf16.mxu1 %v4014_v11  ;;  %v1197_v11 = vld [vmem:[%s4702_s17 + $0x3f0] sm:$0xff] }
 0x19a   : > { %v4075_v23 = vcombine.low %v1193_v10, %v1197_v11 }
 0x19b   : > { %2786 = vmatpush1.bf16.msra.mxu0 %v4011_v22  ;;  %v4076_v22 = vcombine.high %v1193_v10, %v1197_v11 }
 0x19c   : > { %2868 = vmatpush1.bf16.msra.mxu1 %v4013_v13  ;;  %2787 = vmatprep.subr.bf16.mxu0 %v4020_v14  ;;  %v4078_v13 = vcombine.high %v1194_v12, %v1198_v16  ;;  %v1201_v14 = vld [vmem:[%s4702_s17 + $0x410] sm:$0xff] }
 0x19d   : > { %2869 = vmatprep.subr.bf16.mxu1 %v4022_v15  ;;  %v1205_v15 = vld [vmem:[%s4702_s17 + $0x430] sm:$0xff] }
 0x19e   : > { %v4083_v28 = vcombine.low %v1201_v14, %v1205_v15 }
 0x19f   : > { %2788 = vmatpush1.bf16.msra.mxu0 %v4019_v25  ;;  %v4084_v25 = vcombine.high %v1201_v14, %v1205_v15 }
 0x1a0   : > { %2870 = vmatpush1.bf16.msra.mxu1 %v4021_v26  ;;  %2789 = vmatprep.subr.bf16.mxu0 %v4028_v60  ;;  %v4086_v26 = vcombine.high %v1202_v17, %v1206_v19  ;;  %v1209_v60 = vld [vmem:[%s4702_s17 + $0x450] sm:$0xff] }
 0x1a1   : > { %2871 = vmatprep.subr.bf16.mxu1 %v4030_v27  ;;  %v1213_v27 = vld [vmem:[%s4702_s17 + $0x470] sm:$0xff] }
 0x1a2   : > { %v4091_v38 = vcombine.low %v1209_v60, %v1213_v27 }
 0x1a3   : > { %2790 = vmatpush1.bf16.msra.mxu0 %v4027_v32  ;;  %v4092_v32 = vcombine.high %v1209_v60, %v1213_v27 }
 0x1a4   : > { %2872 = vmatpush1.bf16.msra.mxu1 %v4029_v33  ;;  %2791 = vmatprep.subr.bf16.mxu0 %v4036_v34  ;;  %v1217_v33 = vld [vmem:[%s4702_s17 + $0x490] sm:$0xff] }
 0x1a5   : > { %2873 = vmatprep.subr.bf16.mxu1 %v4038_v35  ;;  %v1221_v34 = vld [vmem:[%s4702_s17 + $0x4b0] sm:$0xff]  ;;  %v4094_v35 = vcombine.high %v1210_v29, %v1214_v30 }
 0x1a6   : > { %v4099_v45 = vcombine.low %v1217_v33, %v1221_v34  ;;  %v1273_v30 = vld [vmem:[%s4702_s17 + $0x650] sm:$0xff] }
 0x1a7   : > { %2792 = vmatpush1.bf16.msra.mxu0 %v4035_v40  ;;  %v4100_v40 = vcombine.high %v1217_v33, %v1221_v34  ;;  %v1278_v33 = vld [vmem:[%s4702_s17 + $0x678] sm:$0xff] }
 0x1a8   : > { %2874 = vmatpush1.bf16.msra.mxu1 %v4037_v41  ;;  %2793 = vmatprep.subr.bf16.mxu0 %v4044_v42  ;;  %v4102_v41 = vcombine.high %v1218_v2, %v1222_v37  ;;  %v1225_v42 = vld [vmem:[%s4702_s17 + $0x4d0] sm:$0xff] }
 0x1a9   : > { %2875 = vmatprep.subr.bf16.mxu1 %v4046_v43  ;;  %v1229_v43 = vld [vmem:[%s4702_s17 + $0x4f0] sm:$0xff] }
 0x1aa   : > { %v4108_v48 = vcombine.high %v1225_v42, %v1229_v43  ;;  %v4107_v53 = vcombine.low %v1225_v42, %v1229_v43 }
 0x1ab   : > { %2794 = vmatpush1.bf16.msra.mxu0 %v4043_v49  ;;  %v1233_v49 = vld [vmem:[%s4702_s17 + $0x510] sm:$0xff] }
 0x1ac   : > { %2876 = vmatpush1.bf16.msra.mxu1 %v4045_v50  ;;  %2795 = vmatprep.subr.bf16.mxu0 %v4052_v51  ;;  %v1237_v50 = vld [vmem:[%s4702_s17 + $0x530] sm:$0xff]  ;;  %v1234_v51 = vld [vmem:[%s4702_s17 + $0x518] sm:$0xff] }
 0x1ad   : > { %2877 = vmatprep.subr.bf16.mxu1 %v4054_v52  ;;  %v1238_v52 = vld [vmem:[%s4702_s17 + $0x538] sm:$0xff]  ;;  %v4116_v55 = vcombine.high %v1233_v49, %v1237_v50  ;;  %v4115_v63 = vcombine.low %v1233_v49, %v1237_v50 }
 0x1ae   : > { %v4118_v57 = vcombine.high %v1234_v51, %v1238_v52  ;;  %v4117_v0 = vcombine.low %v1234_v51, %v1238_v52 }
 0x1af   : > { %2796 = vmatpush1.bf16.msra.mxu0 %v4051_v58  ;;  %v1241_v58 = vld [vmem:[%s4702_s17 + $0x550] sm:$0xff] }
 0x1b0   : > { %2878 = vmatpush1.bf16.msra.mxu1 %v4053_v59  ;;  %2797 = vmatprep.subr.bf16.mxu0 %v4060_v61  ;;  %v1245_v59 = vld [vmem:[%s4702_s17 + $0x570] sm:$0xff]  ;;  %v1242_v61 = vld [vmem:[%s4702_s17 + $0x558] sm:$0xff] }
 0x1b1   : > { %2879 = vmatprep.subr.bf16.mxu1 %v4062_v62  ;;  %v1246_v62 = vld [vmem:[%s4702_s17 + $0x578] sm:$0xff]  ;;  %v4124_v1 = vcombine.high %v1241_v58, %v1245_v59  ;;  %v4123_v10 = vcombine.low %v1241_v58, %v1245_v59 }
 0x1b2   : > { %v4126_v3 = vcombine.high %v1242_v61, %v1246_v62  ;;  %v4125_v11 = vcombine.low %v1242_v61, %v1246_v62 }
 0x1b3   : > { %2798 = vmatpush1.bf16.msra.mxu0 %v4059_v5  ;;  %v1249_v5 = vld [vmem:[%s4702_s17 + $0x590] sm:$0xff] }
 0x1b4   : > { %2880 = vmatpush1.bf16.msra.mxu1 %v4061_v7  ;;  %2799 = vmatprep.subr.bf16.mxu0 %v4068_v8  ;;  %v1253_v7 = vld [vmem:[%s4702_s17 + $0x5b0] sm:$0xff]  ;;  %v1250_v8 = vld [vmem:[%s4702_s17 + $0x598] sm:$0xff] }
 0x1b5   : > { %2881 = vmatprep.subr.bf16.mxu1 %v4070_v9  ;;  %v1254_v9 = vld [vmem:[%s4702_s17 + $0x5b8] sm:$0xff]  ;;  %v4132_v12 = vcombine.high %v1249_v5, %v1253_v7  ;;  %v4131_v14 = vcombine.low %v1249_v5, %v1253_v7 }
 0x1b6   : > { %v4134_v16 = vcombine.high %v1250_v8, %v1254_v9  ;;  %v4133_v15 = vcombine.low %v1250_v8, %v1254_v9 }
 0x1b7   : > { %2800 = vmatpush1.bf16.msra.mxu0 %v4067_v20  ;;  %v1257_v20 = vld [vmem:[%s4702_s17 + $0x5d0] sm:$0xff] }
 0x1b8   : > { %2882 = vmatpush1.bf16.msra.mxu1 %v4069_v21  ;;  %2801 = vmatprep.subr.bf16.mxu0 %v4076_v22  ;;  %v1261_v21 = vld [vmem:[%s4702_s17 + $0x5f0] sm:$0xff]  ;;  %v1258_v22 = vld [vmem:[%s4702_s17 + $0x5d8] sm:$0xff] }
 0x1b9   : > { %2883 = vmatprep.subr.bf16.mxu1 %v4078_v13  ;;  %v1262_v13 = vld [vmem:[%s4702_s17 + $0x5f8] sm:$0xff]  ;;  %v4140_v17 = vcombine.high %v1257_v20, %v1261_v21  ;;  %v4139_v60 = vcombine.low %v1257_v20, %v1261_v21 }
 0x1ba   : > { %v4142_v19 = vcombine.high %v1258_v22, %v1262_v13  ;;  %v4141_v27 = vcombine.low %v1258_v22, %v1262_v13 }
 0x1bb   : > { %2802 = vmatpush1.bf16.msra.mxu0 %v4075_v23  ;;  %v1265_v23 = vld [vmem:[%s4702_s17 + $0x610] sm:$0xff] }
 0x1bc   : > { %2884 = vmatpush1.bf16.msra.mxu1 %v4077_v24  ;;  %2812 = vmatprep.subr.bf16.mxu0 %v4084_v25  ;;  %v1269_v24 = vld [vmem:[%s4702_s17 + $0x630] sm:$0xff]  ;;  %v1266_v25 = vld [vmem:[%s4702_s17 + $0x618] sm:$0xff] }
 0x1bd   : > { %2894 = vmatprep.subr.bf16.mxu1 %v4086_v26  ;;  %v1270_v26 = vld [vmem:[%s4702_s17 + $0x638] sm:$0xff]  ;;  %v4147_v34 = vcombine.low %v1265_v23, %v1269_v24 }
 0x1be   : > { %2804 = vmatmul.mubr.bf16.vlgmr.msra.gmra.mrb[12].mxu0 %v5007_v4  ;;  %v4150_v29 = vcombine.high %v1266_v25, %v1270_v26 }
 0x1bf   : > { %2886 = vmatmul.mubr.bf16.vlgmr.msra.gmra.mrb[12].mxu1 %v5007_v4  ;;  %2813 = vmatpush1.bf16.msra.mxu0 %v4083_v28  ;;  %v1230_v4 = vld [vmem:[%s4702_s17 + $0x4f8] sm:$0xff]  ;;  %v4148_v28 = vcombine.high %v1265_v23, %v1269_v24 }
 0x1c0   : > { %2844 = vmatprep.mubr.bf16.mxu0 %v5012_v6  ;;  %2895 = vmatpush1.bf16.msra.mxu1 %v4085_v31  ;;  %v4109_v54 = vcombine.low %v1226_v44, %v1230_v4  ;;  %v1277_v31 = vld [vmem:[%s4702_s17 + $0x670] sm:$0xff] }
 0x1c1   : > { %2926 = vmatprep.mubr.bf16.mxu1 %v5012_v6  ;;  %2814 = vmatprep.subr.bf16.mxu0 %v4092_v32  ;;  %v4110_v6 = vcombine.high %v1226_v44, %v1230_v4  ;;  %v1274_v32 = vld [vmem:[%s4702_s17 + $0x658] sm:$0xff]  ;;  %v4156_v2 = vcombine.high %v1273_v30, %v1277_v31  ;;  %v4155_v42 = vcombine.low %v1273_v30, %v1277_v31 }
 0x1c2   : > { %2896 = vmatprep.subr.bf16.mxu1 %v4094_v35  ;;  %v4149_v35 = vcombine.low %v1266_v25, %v1270_v26  ;;  %v4158_v37 = vcombine.high %v1274_v32, %v1278_v33  ;;  %v4157_v43 = vcombine.low %v1274_v32, %v1278_v33 }
 0x1c3   : > { %2815 = vmatpush1.bf16.msra.mxu0 %v4091_v38  ;;  %v1281_v38 = vld [vmem:[%s4702_s17 + $0x690] sm:$0xff] }
 0x1c4   : > { %2897 = vmatpush1.bf16.msra.mxu1 %v4093_v39  ;;  %2816 = vmatprep.subr.bf16.mxu0 %v4100_v40  ;;  %v1285_v39 = vld [vmem:[%s4702_s17 + $0x6b0] sm:$0xff]  ;;  %v1282_v40 = vld [vmem:[%s4702_s17 + $0x698] sm:$0xff] }
 0x1c5   : > { %2898 = vmatprep.subr.bf16.mxu1 %v4102_v41  ;;  %v1286_v41 = vld [vmem:[%s4702_s17 + $0x6b8] sm:$0xff]  ;;  %v4164_v44 = vcombine.high %v1281_v38, %v1285_v39  ;;  %v4163_v49 = vcombine.low %v1281_v38, %v1285_v39 }
 0x1c6   : > { %v4166_v4 = vcombine.high %v1282_v40, %v1286_v41  ;;  %v4165_v50 = vcombine.low %v1282_v40, %v1286_v41  ;;  %v1069_v40 = vld [vmem:[#allocation2] sm:$0xff] }
 0x1c7   : > { %2817 = vmatpush1.bf16.msra.mxu0 %v4099_v45  ;;  %v1289_v45 = vld [vmem:[%s4702_s17 + $0x6d0] sm:$0xff] }
 0x1c8   : > { %2899 = vmatpush1.bf16.msra.mxu1 %v4101_v47  ;;  %2818 = vmatprep.subr.bf16.mxu0 %v4108_v48  ;;  %v1293_v47 = vld [vmem:[%s4702_s17 + $0x6f0] sm:$0xff]  ;;  %v1290_v48 = vld [vmem:[%s4702_s17 + $0x6d8] sm:$0xff] }
 0x1c9   : > { %2900 = vmatprep.subr.bf16.mxu1 %v4110_v6  ;;  %v1294_v6 = vld [vmem:[%s4702_s17 + $0x6f8] sm:$0xff]  ;;  %v4172_v51 = vcombine.high %v1289_v45, %v1293_v47  ;;  %v4171_v58 = vcombine.low %v1289_v45, %v1293_v47 }
 0x1ca   : > { %v4174_v52 = vcombine.high %v1290_v48, %v1294_v6  ;;  %v4173_v59 = vcombine.low %v1290_v48, %v1294_v6 }
 0x1cb   : > { %2819 = vmatpush1.bf16.msra.mxu0 %v4107_v53  ;;  %v1297_v53 = vld [vmem:[%s4702_s17 + $0x710] sm:$0xff] }
 0x1cc   : > { %2901 = vmatpush1.bf16.msra.mxu1 %v4109_v54  ;;  %2820 = vmatprep.subr.bf16.mxu0 %v4116_v55  ;;  %v1301_v54 = vld [vmem:[%s4702_s17 + $0x730] sm:$0xff]  ;;  %v1298_v55 = vld [vmem:[%s4702_s17 + $0x718] sm:$0xff] }
 0x1cd   : > { %2902 = vmatprep.subr.bf16.mxu1 %v4118_v57  ;;  %v1302_v57 = vld [vmem:[%s4702_s17 + $0x738] sm:$0xff]  ;;  %v4180_v61 = vcombine.high %v1297_v53, %v1301_v54  ;;  %v4179_v5 = vcombine.low %v1297_v53, %v1301_v54  ;;  %v1070_v53 = vld [vmem:[#allocation2 + $0x8] sm:$0xff] }
 0x1ce   : > { %v4182_v62 = vcombine.high %v1298_v55, %v1302_v57  ;;  %v4181_v7 = vcombine.low %v1298_v55, %v1302_v57  ;;  %v4552_v57 = vld [vmem:[%s5454_s5 + $0x40] sm:$0xff] (!%p4207_p6)  }
 0x1cf   : > { %2821 = vmatpush1.bf16.msra.mxu0 %v4115_v63  ;;  %v1305_v63 = vld [vmem:[%s4702_s17 + $0x750] sm:$0xff] }
 0x1d0   : > { %2903 = vmatpush1.bf16.msra.mxu1 %v4117_v0  ;;  %2822 = vmatprep.subr.bf16.mxu0 %v4124_v1  ;;  %v1309_v0 = vld [vmem:[%s4702_s17 + $0x770] sm:$0xff]  ;;  %v1306_v1 = vld [vmem:[%s4702_s17 + $0x758] sm:$0xff] }
 0x1d1   : > { %2904 = vmatprep.subr.bf16.mxu1 %v4126_v3  ;;  %v1310_v3 = vld [vmem:[%s4702_s17 + $0x778] sm:$0xff]  ;;  %v4188_v8 = vcombine.high %v1305_v63, %v1309_v0  ;;  %v4187_v20 = vcombine.low %v1305_v63, %v1309_v0  ;;  %v4557_v63 = vld [vmem:[%s5454_s5 + $0xc8] sm:$0xff] (!%p4207_p6)  }
 0x1d2   : > { %v4190_v9 = vcombine.high %v1306_v1, %v1310_v3  ;;  %v4189_v21 = vcombine.low %v1306_v1, %v1310_v3  ;;  %v4558_v0 = vld [vmem:[%s5454_s5 + $0x8] sm:$0xff] (!%p4207_p6)   ;;  %v4560_v3 = vld [vmem:[%s5454_s5 + $0x50] sm:$0xff] (!%p4207_p6)  }
 0x1d3   : > { %2823 = vmatpush1.bf16.msra.mxu0 %v4123_v10  ;;  %v1313_v10 = vld [vmem:[%s4702_s17 + $0x790] sm:$0xff]  ;;  %v4559_v1 = vld [vmem:[%s5454_s5 + $0x88] sm:$0xff] (!%p4207_p6)  }
 0x1d4   : > { %2905 = vmatpush1.bf16.msra.mxu1 %v4125_v11  ;;  %2824 = vmatprep.subr.bf16.mxu0 %v4132_v12  ;;  %v1317_v11 = vld [vmem:[%s4702_s17 + $0x7b0] sm:$0xff]  ;;  %v1314_v12 = vld [vmem:[%s4702_s17 + $0x798] sm:$0xff] }
 0x1d5   : > { %2906 = vmatprep.subr.bf16.mxu1 %v4134_v16  ;;  %v1318_v16 = vld [vmem:[%s4702_s17 + $0x7b8] sm:$0xff]  ;;  %v4196_v22 = vcombine.high %v1313_v10, %v1317_v11  ;;  %v4195_v23 = vcombine.low %v1313_v10, %v1317_v11 }
 0x1d6   : > { %v4198_v13 = vcombine.high %v1314_v12, %v1318_v16  ;;  %v4197_v24 = vcombine.low %v1314_v12, %v1318_v16  ;;  %v4565_v10 = vld [vmem:[%s5454_s5 + $0xd8] sm:$0xff] (!%p4207_p6)   ;;  %v4568_v16 = vld [vmem:[%s5454_s5 + $0x60] sm:$0xff] (!%p4207_p6)  }
 0x1d7   : > { %2825 = vmatpush1.bf16.msra.mxu0 %v4131_v14  ;;  %v1321_v14 = vld [vmem:[%s4702_s17 + $0x7d0] sm:$0xff]  ;;  %v4566_v11 = vld [vmem:[%s5454_s5 + $0x18] sm:$0xff] (!%p4207_p6)  }
 0x1d8   : > { %2907 = vmatpush1.bf16.msra.mxu1 %v4133_v15  ;;  %2826 = vmatprep.subr.bf16.mxu0 %v4140_v17  ;;  %v1325_v15 = vld [vmem:[%s4702_s17 + $0x7f0] sm:$0xff]  ;;  %v1322_v17 = vld [vmem:[%s4702_s17 + $0x7d8] sm:$0xff] }
 0x1d9   : > { %2908 = vmatprep.subr.bf16.mxu1 %v4142_v19  ;;  %v1326_v19 = vld [vmem:[%s4702_s17 + $0x7f8] sm:$0xff]  ;;  %v4204_v25 = vcombine.high %v1321_v14, %v1325_v15  ;;  %s3820_s17 = sld [smem:[#allocation3]] (!%p4207_p6) }
 0x1da   : > { %v4206_v26 = vcombine.high %v1322_v17, %v1326_v19  ;;  %v4567_v12 = vld [vmem:[%s5454_s5 + $0x98] sm:$0xff] (!%p4207_p6)  }
 0x1db   : > { %2827 = vmatpush1.bf16.msra.mxu0 %v4139_v60  ;;  %v4203_v60 = vcombine.low %v1321_v14, %v1325_v15  ;;  %v4573_v14 = vld [vmem:[%s5454_s5 + $0xe8] sm:$0xff] (!%p4207_p6)  }
 0x1dc   : > { %2909 = vmatpush1.bf16.msra.mxu1 %v4141_v27  ;;  %2828 = vmatprep.subr.bf16.mxu0 %v4148_v28  ;;  %v4205_v27 = vcombine.low %v1322_v17, %v1326_v19  ;;  %v4574_v15 = vld [vmem:[%s5454_s5 + $0x28] sm:$0xff] (!%p4207_p6)   ;;  %v4576_v19 = vld [vmem:[%s5454_s5 + $0x70] sm:$0xff] (!%p4207_p6)  }
 0x1dd   : > { %2910 = vmatprep.subr.bf16.mxu1 %v4150_v29  ;;  %v4575_v17 = vld [vmem:[%s5454_s5 + $0xa8] sm:$0xff] (!%p4207_p6)  }
 0x1df   : > { %2829 = vmatpush1.bf16.msra.mxu0 %v4147_v34 }
 0x1e0   : > { %2911 = vmatpush1.bf16.msra.mxu1 %v4149_v35  ;;  %2830 = vmatprep.subr.bf16.mxu0 %v4156_v2 }
 0x1e1   : > { %2912 = vmatprep.subr.bf16.mxu1 %v4158_v37 }
 0x1e3   : > { %2831 = vmatpush1.bf16.msra.mxu0 %v4155_v42 }
 0x1e4   : > { %2913 = vmatpush1.bf16.msra.mxu1 %v4157_v43  ;;  %2832 = vmatprep.subr.bf16.mxu0 %v4164_v44 }
 0x1e5   : > { %2914 = vmatprep.subr.bf16.mxu1 %v4166_v4 }
 0x1e7   : > { %2833 = vmatpush1.bf16.msra.mxu0 %v4163_v49 }
 0x1e8   : > { %2915 = vmatpush1.bf16.msra.mxu1 %v4165_v50  ;;  %2834 = vmatprep.subr.bf16.mxu0 %v4172_v51 }
 0x1e9   : > { %2916 = vmatprep.subr.bf16.mxu1 %v4174_v52 }
 0x1eb   : > { %2835 = vmatpush1.bf16.msra.mxu0 %v4171_v58  ;;  %v4553_v58 = vld [vmem:[%s5454_s5 + $0xc0] sm:$0xff] (!%p4207_p6)  }
 0x1ec   : > { %2917 = vmatpush1.bf16.msra.mxu1 %v4173_v59  ;;  %2836 = vmatprep.subr.bf16.mxu0 %v4180_v61  ;;  %v4554_v59 = vld [vmem:[%s5454_s5] sm:$0xff] (!%p4207_p6)  }
 0x1ed   : > { %2918 = vmatprep.subr.bf16.mxu1 %v4182_v62  ;;  %v4555_v61 = vld [vmem:[%s5454_s5 + $0x80] sm:$0xff] (!%p4207_p6)   ;;  %v4556_v62 = vld [vmem:[%s5454_s5 + $0x48] sm:$0xff] (!%p4207_p6)  }
 0x1ef   : > { %2837 = vmatpush1.bf16.msra.mxu0 %v4179_v5  ;;  %v4561_v5 = vld [vmem:[%s5454_s5 + $0xd0] sm:$0xff] (!%p4207_p6)  }
 0x1f0   : > { %2919 = vmatpush1.bf16.msra.mxu1 %v4181_v7  ;;  %2838 = vmatprep.subr.bf16.mxu0 %v4188_v8  ;;  %v4562_v7 = vld [vmem:[%s5454_s5 + $0x10] sm:$0xff] (!%p4207_p6)  }
 0x1f1   : > { %2920 = vmatprep.subr.bf16.mxu1 %v4190_v9  ;;  %v4563_v8 = vld [vmem:[%s5454_s5 + $0x90] sm:$0xff] (!%p4207_p6)   ;;  %v4564_v9 = vld [vmem:[%s5454_s5 + $0x58] sm:$0xff] (!%p4207_p6)  }
 0x1f3   : > { %2839 = vmatpush1.bf16.msra.mxu0 %v4187_v20  ;;  %v4569_v20 = vld [vmem:[%s5454_s5 + $0xe0] sm:$0xff] (!%p4207_p6)  }
 0x1f4   : > { %2921 = vmatpush1.bf16.msra.mxu1 %v4189_v21  ;;  %2840 = vmatprep.subr.bf16.mxu0 %v4196_v22  ;;  %v4570_v21 = vld [vmem:[%s5454_s5 + $0x20] sm:$0xff] (!%p4207_p6)  }
 0x1f5   : > { %2922 = vmatprep.subr.bf16.mxu1 %v4198_v13  ;;  %v4571_v22 = vld [vmem:[%s5454_s5 + $0xa0] sm:$0xff] (!%p4207_p6)   ;;  %v4572_v13 = vld [vmem:[%s5454_s5 + $0x68] sm:$0xff] (!%p4207_p6)  }
 0x1f7   : > { %2841 = vmatpush1.bf16.msra.mxu0 %v4195_v23  ;;  %v4577_v23 = vld [vmem:[%s5454_s5 + $0xf0] sm:$0xff] (!%p4207_p6)  }
 0x1f8   : > { %2923 = vmatpush1.bf16.msra.mxu1 %v4197_v24  ;;  %2842 = vmatprep.subr.bf16.mxu0 %v4204_v25  ;;  %v4578_v24 = vld [vmem:[%s5454_s5 + $0x30] sm:$0xff] (!%p4207_p6)   ;;  %v2993_v25 = vsub.s32 (!%p4207_p6), 0, %v4989_v46 }
 0x1f9   : > { %2924 = vmatprep.subr.bf16.mxu1 %v4206_v26  ;;  %v4579_v26 = vld [vmem:[%s5454_s5 + $0xb0] sm:$0xff] (!%p4207_p6)  }
 0x1fb   : > { %2843 = vmatpush1.bf16.msra.mxu0 %v4203_v60  ;;  %v2997_v60 = vsub.s32 (!%p4207_p6), 1, %v4989_v46 }
 0x1fc   : > { %2925 = vmatpush1.bf16.msra.mxu1 %v4205_v27  ;;  %4365 = vmatprep.subr.bf16.mxu0 (!%p4207_p6), %v4552_v57  ;;  %v4580_v27 = vld [vmem:[%s5454_s5 + $0x78] sm:$0xff] (!%p4207_p6)  }
 0x1fd   : > { %4387 = vmatprep.subr.bf16.mxu1 (!%p4207_p6), %v4553_v58 }
 0x1fe   : > { %2845 = vmatmul.mubr.bf16.vlgmr.msra.gmra.mrb[12].mxu0 %v5089_v18 }
 0x1ff   : > { %2927 = vmatmul.mubr.bf16.vlgmr.msra.gmra.mrb[12].mxu1 %v5089_v18  ;;  %4366 = vmatpush3.bf16.msra.mxu0 (!%p4207_p6), %v4554_v59 }
 0x200   : > { %4388 = vmatpush3.bf16.msra.mxu1 (!%p4207_p6), %v4555_v61  ;;  %4367 = vmatprep.subr.bf16.mxu0 (!%p4207_p6), %v4556_v62  ;;  %v4586_v61 = vld [vmem:[%s5454_s5 + $0x100] sm:$0xff] (!%p4207_p6)  }
 0x201   : > { %4389 = vmatprep.subr.bf16.mxu1 (!%p4207_p6), %v4557_v63 }
 0x203   : > { %4368 = vmatpush3.bf16.msra.mxu0 (!%p4207_p6), %v4558_v0 }
 0x204   : > { %4390 = vmatpush3.bf16.msra.mxu1 (!%p4207_p6), %v4559_v1  ;;  %4369 = vmatprep.subr.bf16.mxu0 (!%p4207_p6), %v4560_v3  ;;  %v4588_v1 = vld [vmem:[%s5454_s5 + $0x148] sm:$0xff] (!%p4207_p6)   ;;  %v4587_v3 = vld [vmem:[%s5454_s5 + $0x180] sm:$0xff] (!%p4207_p6)  }
 0x205   : > { %4391 = vmatprep.subr.bf16.mxu1 (!%p4207_p6), %v4561_v5  ;;  %v4589_v5 = vld [vmem:[%s5454_s5 + $0x1c8] sm:$0xff] (!%p4207_p6)  }
 0x207   : > { %4370 = vmatpush3.bf16.msra.mxu0 (!%p4207_p6), %v4562_v7  ;;  %v4590_v7 = vld [vmem:[%s5454_s5 + $0x108] sm:$0xff] (!%p4207_p6)  }
 0x208   : > { %4392 = vmatpush3.bf16.msra.mxu1 (!%p4207_p6), %v4563_v8  ;;  %4371 = vmatprep.subr.bf16.mxu0 (!%p4207_p6), %v4564_v9 }
 0x209   : > { %4393 = vmatprep.subr.bf16.mxu1 (!%p4207_p6), %v4565_v10  ;;  %v4592_v10 = vld [vmem:[%s5454_s5 + $0x150] sm:$0xff] (!%p4207_p6)  }
 0x20b   : > { %4372 = vmatpush3.bf16.msra.mxu0 (!%p4207_p6), %v4566_v11  ;;  %v4591_v11 = vld [vmem:[%s5454_s5 + $0x188] sm:$0xff] (!%p4207_p6)  }
 0x20c   : > { %4394 = vmatpush3.bf16.msra.mxu1 (!%p4207_p6), %v4567_v12  ;;  %4373 = vmatprep.subr.bf16.mxu0 (!%p4207_p6), %v4568_v16  ;;  %v4593_v12 = vld [vmem:[%s5454_s5 + $0x1d0] sm:$0xff] (!%p4207_p6)  }
 0x20d   : > { %4395 = vmatprep.subr.bf16.mxu1 (!%p4207_p6), %v4569_v20  ;;  %v4594_v16 = vld [vmem:[%s5454_s5 + $0x110] sm:$0xff] (!%p4207_p6)  }
 0x20f   : > { %4374 = vmatpush3.bf16.msra.mxu0 (!%p4207_p6), %v4570_v21 }
 0x210   : > { %4396 = vmatpush3.bf16.msra.mxu1 (!%p4207_p6), %v4571_v22  ;;  %4375 = vmatprep.subr.bf16.mxu0 (!%p4207_p6), %v4572_v13  ;;  %v4596_v22 = vld [vmem:[%s5454_s5 + $0x158] sm:$0xff] (!%p4207_p6)   ;;  %v4595_v13 = vld [vmem:[%s5454_s5 + $0x190] sm:$0xff] (!%p4207_p6)  }
 0x211   : > { %4397 = vmatprep.subr.bf16.mxu1 (!%p4207_p6), %v4573_v14  ;;  %v4597_v14 = vld [vmem:[%s5454_s5 + $0x1d8] sm:$0xff] (!%p4207_p6)  }
 0x213   : > { %4376 = vmatpush3.bf16.msra.mxu0 (!%p4207_p6), %v4574_v15  ;;  %v4598_v15 = vld [vmem:[%s5454_s5 + $0x118] sm:$0xff] (!%p4207_p6)  }
 0x214   : > { %4398 = vmatpush3.bf16.msra.mxu1 (!%p4207_p6), %v4575_v17  ;;  %4377 = vmatprep.subr.bf16.mxu0 (!%p4207_p6), %v4576_v19  ;;  %v4600_v19 = vld [vmem:[%s5454_s5 + $0x160] sm:$0xff] (!%p4207_p6)  }
 0x215   : > { %4399 = vmatprep.subr.bf16.mxu1 (!%p4207_p6), %v4577_v23  ;;  %v4599_v23 = vld [vmem:[%s5454_s5 + $0x198] sm:$0xff] (!%p4207_p6)  }
 0x217   : > { %4378 = vmatpush3.bf16.msra.mxu0 (!%p4207_p6), %v4578_v24  ;;  %v4601_v24 = vld [vmem:[%s5454_s5 + $0x1e0] sm:$0xff] (!%p4207_p6)  }
 0x218   : > { %4400 = vmatpush3.bf16.msra.mxu1 (!%p4207_p6), %v4579_v26  ;;  %4379 = vmatprep.subr.bf16.mxu0 (!%p4207_p6), %v4580_v27  ;;  %v4602_v26 = vld [vmem:[%s5454_s5 + $0x120] sm:$0xff] (!%p4207_p6)   ;;  %v4604_v27 = vld [vmem:[%s5454_s5 + $0x168] sm:$0xff] (!%p4207_p6)  }
 0x251   : > { %v2682_v28 = vpop.f32.mrb[8].mxu0  ;;  %v2764_v29 = vpop.f32.mrb[8].mxu1 }
 0x252   : > { %v2684_v30 = vpop.f32.mrb[9].mxu0  ;;  %v2766_v31 = vpop.f32.mrb[9].mxu1 }
 0x253   : > { %v2943_v32 = vcombine.low %v2682_v28, %v2684_v30  ;;  %v2944_v33 = vcombine.low %v2764_v29, %v2766_v31  ;;  %v2686_v34 = vpop.f32.mrb[10].mxu0  ;;  %v2768_v35 = vpop.f32.mrb[10].mxu1  ;;  %v3001_v28 = vsub.s32 (!%p4207_p6), 2, %v4989_v46  ;;  %v4581_v29 = vld [vmem:[%s5454_s5 + $0xf8] sm:$0xff] (!%p4207_p6)   ;;  %v3005_v30 = vsub.s32 (!%p4207_p6), 3, %v4989_v46 }
 0x254   : > { %v2687_v2 = vpop.f32.mrb[11].mxu0  ;;  %v2769_v37 = vpop.f32.mrb[11].mxu1  ;;  %v4582_v31 = vld [vmem:[%s5454_s5 + $0x38] sm:$0xff] (!%p4207_p6)   ;;  %4401 = vmatprep.subr.bf16.mxu1 (!%p4207_p6), %v4581_v29 }
 0x255   : > { %v2951_v38 = vrot.slane %v2943_v32, %v4993_v56  ;;  %v2958_v39 = vrot.slane %v2944_v33, %v4993_v56  ;;  %v4583_v32 = vld [vmem:[%s5454_s5 + $0xb8] sm:$0xff] (!%p4207_p6)   ;;  %4380 = vmatpush3.bf16.msra.mxu0 (!%p4207_p6), %v4582_v31  ;;  %v2989_v33 = vld [vmem:[%s5453_s4] sm:$0xff] (!%p4207_p6)  ;;  %v4606_v31 = vld [vmem:[%s5454_s5 + $0x128] sm:$0xff] (!%p4207_p6)  }
 0x256   : > { %4402 = vmatpush3.bf16.msra.mxu1 (!%p4207_p6), %v4583_v32  ;;  %v2994_v34 = vrot.slane (!%p4207_p6), %v2989_v33, %v2993_v25  ;;  %v2998_v35 = vrot.slane (!%p4207_p6), %v2989_v33, %v2997_v60  ;;  %v3002_v2 = vrot.slane (!%p4207_p6), %v2989_v33, %v3001_v28  ;;  %v3006_v37 = vrot.slane (!%p4207_p6), %v2989_v33, %v3005_v30  ;;  %v4603_v28 = vld [vmem:[%s5454_s5 + $0x1a0] sm:$0xff] (!%p4207_p6)   ;;  %v4605_v30 = vld [vmem:[%s5454_s5 + $0x1e8] sm:$0xff] (!%p4207_p6)  }
 0x257   : > { %v2959_v41 = vcombine.low %v2951_v38, %v2958_v39  ;;  %v4584_v38 = vld [vmem:[%s5454_s5 + $0x140] sm:$0xff] (!%p4207_p6)  }
 0x258   : > { %v4585_v39 = vld [vmem:[%s5454_s5 + $0x1c0] sm:$0xff] (!%p4207_p6)   ;;  %4409 = vmatprep.subr.bf16.mxu0 (!%p4207_p6), %v4584_v38  ;;  %v4609_v38 = vld [vmem:[%s5454_s5 + $0x1f0] sm:$0xff] (!%p4207_p6)  }
 0x259   : > { %v2979_v42 = vadd.f32 %v2959_v41, %v1069_v40  ;;  %v3023_v40 = vcombine.low (!%p4207_p6), %v2994_v34, %v2998_v35  ;;  %v3024_v41 = vcombine.low (!%p4207_p6), %v3002_v2, %v3006_v37  ;;  %4431 = vmatprep.subr.bf16.mxu1 (!%p4207_p6), %v4585_v39  ;;  %v4608_v34 = vld [vmem:[%s5454_s5 + $0x170] sm:$0xff] (!%p4207_p6)   ;;  %v4607_v35 = vld [vmem:[%s5454_s5 + $0x1a8] sm:$0xff] (!%p4207_p6)  }
 0x25a   : > { %v4610_v39 = vld [vmem:[%s5454_s5 + $0x130] sm:$0xff] (!%p4207_p6)  }
 0x25b   : > { %2981 = vst [vmem:[#allocation2] sm:$0xff] %v2979_v42  ;;  %v3031_v42 = vrot.slane (!%p4207_p6), %v3023_v40, %v4993_v56 }
 0x2d1   : > { %v2846_v43 = vpop.f32.mrb[12].mxu0 }
 0x2d2   : > { %v2928_v18 = vpop.f32.mrb[12].mxu1  ;;  %v2848_v44 = vpop.f32.mrb[13].mxu0 }
 0x2d3   : > { %v2960_v4 = vcombine.low %v2846_v43, %v2848_v44  ;;  %v2930_v45 = vpop.f32.mrb[13].mxu1  ;;  %v2850_v47 = vpop.f32.mrb[14].mxu0  ;;  %v3038_v43 = vrot.slane (!%p4207_p6), %v3024_v41, %v4993_v56 }
 0x2d4   : > { %v2961_v48 = vcombine.low %v2928_v18, %v2930_v45  ;;  %v2932_v6 = vpop.f32.mrb[14].mxu1  ;;  %v2851_v49 = vpop.f32.mrb[15].mxu0  ;;  %v2987_v18 = vld [vmem:[#allocation2] sm:$0xff] (!%p4207_p6)  ;;  %v3009_v47 = vsub.s32 (!%p4207_p6), 4, %v4989_v46 }
 0x2d5   : > { %v2968_v50 = vrot.slane %v2960_v4, %v4993_v56  ;;  %v2933_v51 = vpop.f32.mrb[15].mxu1  ;;  %v3039_v44 = vcombine.low (!%p4207_p6), %v3031_v42, %v3038_v43  ;;  %v4612_v42 = vld [vmem:[%s5454_s5 + $0x178] sm:$0xff] (!%p4207_p6)  }
 0x2d6   : > { %v2975_v52 = vrot.slane %v2961_v48, %v4993_v56  ;;  %2986 = sbr.rel (%p4207_p6) target bundleno = 1152 (0x480), region = 60  ;;  %v3013_v48 = vsub.s32 (!%p4207_p6), 5, %v4989_v46  ;;  %v3021_v51 = vsub.s32 (!%p4207_p6), 7, %v4989_v46 }
 0x2d7   : > { %v3059_v4 = vadd.f32 (!%p4207_p6), %v3039_v44, %v2987_v18  ;;  %v4613_v18 = vld [vmem:[%s5454_s5 + $0x1f8] sm:$0xff] (!%p4207_p6)  }
 0x2d8   : > { %v2976_v54 = vcombine.low %v2968_v50, %v2975_v52  ;;  %v3017_v50 = vsub.s32 (!%p4207_p6), 6, %v4989_v46  ;;  %v3014_v57 = vrot.slane (!%p4207_p6), %v2989_v33, %v3013_v48  ;;  %v3022_v63 = vrot.slane (!%p4207_p6), %v2989_v33, %v3021_v51  ;;  %v4614_v44 = vld [vmem:[%s5454_s5 + $0x138] sm:$0xff] (!%p4207_p6)  }
 0x2d9   : > { %v3061_v45 = vmax.f32 (!%p4207_p6), %v3059_v4, 0.0  ;;  %v4615_v4 = vld [vmem:[%s5454_s5 + $0x1b8] sm:$0xff] (!%p4207_p6)  }
 0x2da   : > { %v2980_v55 = vadd.f32 %v2976_v54, %v1070_v53  ;;  %v3018_v62 = vrot.slane (!%p4207_p6), %v2989_v33, %v3017_v50 }
 0x2db   : > { %v3072_v6 = vrot.slane (!%p4207_p6), %v3061_v45, %v4993_v56  ;;  %v3065_v49 = vcombine.high (!%p4207_p6), %v3061_v45, %v3061_v45 }
 0x2dc   : > { %2982 = vst [vmem:[#allocation2 + $0x8] sm:$0xff] %v2980_v55  ;;  %v3010_v55 = vrot.slane (!%p4207_p6), %v2989_v33, %v3009_v47  ;;  %v3041_v9 = vcombine.low (!%p4207_p6), %v3018_v62, %v3022_v63 }
 0x2dd   : > { %v3080_v52 = vcombine.high %v3072_v6, %v3072_v6  ;;  %v3079_v53 = vrot.slane %v3065_v49, %v4993_v56  ;;  %v3107_v54 = vpack.c.bf16 %v3072_v6, %v3072_v6  ;;  %v4208_v6 = vld [vmem:[%s5455_s6] ss:$0 sm:$0xff] }
 0x2de   : > { %v3040_v8 = vcombine.low %v3010_v55, %v3014_v57  ;;  %v3055_v21 = vrot.slane %v3041_v9, %v4993_v56 }
 0x2df   : > { %v3108_v58 = vpack.c.bf16 %v3080_v52, %v3080_v52  ;;  %v3081_v59 = vcombine.high %v3079_v53, %v3079_v53  ;;  %v3109_v0 = vpack.c.bf16 %v3079_v53, %v3079_v53 }
 0x2e0   : > { %v3048_v20 = vrot.slane %v3040_v8, %v4993_v56 }
 0x2e1   : > { %3666 = vmatprep.mubr.bf16.mxu0 %v3108_v58  ;;  %v3110_v46 = vpack.c.bf16 %v3081_v59, %v3081_v59 }
 0x2e2   : > { %3667 = vmatmul.mubr.bf16.vlgmr.msra.gmra.mrb[0].mxu0 %v3107_v54  ;;  %v3056_v17 = vcombine.low %v3048_v20, %v3055_v21 }
 0x2e3   : > { %3706 = vmatprep.mubr.bf16.mxu1 %v3110_v46  ;;  %4410 = vmatpush3.bf16.msra.mxu0 %v4586_v61  ;;  %v2988_v25 = vld [vmem:[#allocation2 + $0x8] sm:$0xff] }
 0x2e4   : > { %3707 = vmatmul.mubr.bf16.vlgmr.msra.gmra.mrb[0].mxu1 %v3109_v0  ;;  %4411 = vmatprep.subr.bf16.mxu0 %v4588_v1  ;;  %v3060_v60 = vadd.f32 %v3056_v17, %v2988_v25 }
 0x2e5   : > { %4432 = vmatpush3.bf16.msra.mxu1 %v4587_v3 }
 0x2e6   : > { %4433 = vmatprep.subr.bf16.mxu1 %v4589_v5  ;;  %v3062_v29 = vmax.f32 %v3060_v60, 0.0 }
 0x2e7   : > { %4412 = vmatpush3.bf16.msra.mxu0 %v4590_v7  ;;  %v3795_v7 = vand.u32 127, %v1039_v36 }
 0x2e8   : > { %4413 = vmatprep.subr.bf16.mxu0 %v4592_v10  ;;  %v3089_v32 = vrot.slane %v3062_v29, %v4993_v56  ;;  %v3082_v33 = vcombine.high %v3062_v29, %v3062_v29 }
 0x2e9   : > { %4434 = vmatpush3.bf16.msra.mxu1 %v4591_v11  ;;  %vm3796_vm0 = vcmp.lt.s32.totalorder %v3795_v7, 32  ;;  %vm3824_vm3 = vcmp.eq.s32.totalorder %v3795_v7, 32 }
 0x2ea   : > { %4435 = vmatprep.subr.bf16.mxu1 %v4593_v12  ;;  %v3097_v2 = vcombine.high %v3089_v32, %v3089_v32  ;;  %v3096_v37 = vrot.slane %v3082_v33, %v4993_v56  ;;  %v4611_v56 = vld [vmem:[%s5454_s5 + $0x1b0] sm:$0xff]   ;;  %v3111_v45 = vpack.c.bf16 %v3089_v32, %v3089_v32 }
 0x2eb   : > { %4414 = vmatpush3.bf16.msra.mxu0 %v4594_v16 }
 0x2ec   : > { %4415 = vmatprep.subr.bf16.mxu0 %v4596_v22  ;;  %v3112_v40 = vpack.c.bf16 %v3097_v2, %v3097_v2  ;;  %v3098_v41 = vcombine.high %v3096_v37, %v3096_v37  ;;  %v3113_v47 = vpack.c.bf16 %v3096_v37, %v3096_v37 }
 0x2ed   : > { %4436 = vmatpush3.bf16.msra.mxu1 %v4595_v13 }
 0x2ee   : > { %4437 = vmatprep.subr.bf16.mxu1 %v4597_v14  ;;  %3746 = vmatprep.mubr.bf16.mxu0 %v3112_v40  ;;  %v3114_v43 = vpack.c.bf16 %v3098_v41, %v3098_v41 }
 0x2ef   : > { %4416 = vmatpush3.bf16.msra.mxu0 %v4598_v15 }
 0x2f0   : > { %4417 = vmatprep.subr.bf16.mxu0 %v4600_v19  ;;  %3786 = vmatprep.mubr.bf16.mxu1 %v3114_v43 }
 0x2f1   : > { %4438 = vmatpush3.bf16.msra.mxu1 %v4599_v23 }
 0x2f2   : > { %4439 = vmatprep.subr.bf16.mxu1 %v4601_v24 }
 0x2f3   : > { %4418 = vmatpush3.bf16.msra.mxu0 %v4602_v26 }
 0x2f4   : > { %4419 = vmatprep.subr.bf16.mxu0 %v4604_v27 }
 0x2f5   : > { %4440 = vmatpush3.bf16.msra.mxu1 %v4603_v28 }
 0x2f6   : > { %4441 = vmatprep.subr.bf16.mxu1 %v4605_v30 }
 0x2f7   : > { %4420 = vmatpush3.bf16.msra.mxu0 %v4606_v31  ;;  %v3821_v31 = vstv %s3820_s17 }
 0x2f8   : > { %4421 = vmatprep.subr.bf16.mxu0 %v4608_v34 }
 0x2f9   : > { %4442 = vmatpush3.bf16.msra.mxu1 %v4607_v35 }
 0x2fa   : > { %4443 = vmatprep.subr.bf16.mxu1 %v4609_v38 }
 0x2fb   : > { %4422 = vmatpush3.bf16.msra.mxu0 %v4610_v39 }
 0x2fc   : > { %4423 = vmatprep.subr.bf16.mxu0 %v4612_v42 }
 0x2fd   : > { %4444 = vmatpush3.bf16.msra.mxu1 %v4611_v56 }
 0x2fe   : > { %4445 = vmatprep.subr.bf16.mxu1 %v4613_v18 }
 0x2ff   : > { %4424 = vmatpush3.bf16.msra.mxu0 %v4614_v44 }
 0x301   : > { %4446 = vmatpush3.bf16.msra.mxu1 %v4615_v4 }
 0x302   : > { %3747 = vmatmul.mubr.bf16.vlgmr.msra.gmra.mrb[4].mxu0 %v3111_v45 }
 0x304   : > { %3787 = vmatmul.mubr.bf16.vlgmr.msra.gmra.mrb[4].mxu1 %v3113_v47 }
 0x3b5   : > { %v4381_v48 = vpop.f32.mrb[0].mxu0 }
 0x3b6   : > { %v4382_v49 = vpop.f32.mrb[1].mxu0 }
 0x3b7   : > { %v4403_v50 = vpop.f32.mrb[0].mxu1  ;;  %v4383_v51 = vadd.f32 %v4382_v49, %v4381_v48  ;;  %v4384_v52 = vpop.f32.mrb[2].mxu0 }
 0x3b8   : > { %v4404_v53 = vpop.f32.mrb[1].mxu1  ;;  %v4385_v54 = vpop.f32.mrb[3].mxu0 }
 0x3b9   : > { %v3669_v55 = vadd.f32 %v4383_v51, %v4208_v6  ;;  %v4405_v57 = vadd.f32 %v4404_v53, %v4403_v50  ;;  %v4406_v58 = vpop.f32.mrb[2].mxu1 }
 0x3ba   : > { %v4407_v59 = vpop.f32.mrb[3].mxu1 }
 0x3bb   : > { %v3709_v61 = vadd.f32 %v4405_v57, %v3669_v55 }
 0x3d5   : > { %v4425_v62 = vpop.f32.mrb[4].mxu0 }
 0x3d6   : > { %v4426_v63 = vpop.f32.mrb[5].mxu0 }
 0x3d7   : > { %v4447_v0 = vpop.f32.mrb[4].mxu1  ;;  %v4427_v1 = vadd.f32 %v4426_v63, %v4425_v62  ;;  %v4428_v46 = vpop.f32.mrb[6].mxu0 }
 0x3d8   : > { %v4448_v3 = vpop.f32.mrb[5].mxu1  ;;  %v4429_v5 = vpop.f32.mrb[7].mxu0 }
 0x3d9   : > { %v3749_v8 = vadd.f32 %v4427_v1, %v3709_v61  ;;  %v4449_v9 = vadd.f32 %v4448_v3, %v4447_v0  ;;  %v4450_v10 = vpop.f32.mrb[6].mxu1 }
 0x3da   : > { %v4451_v11 = vpop.f32.mrb[7].mxu1 }
 0x3db   : > { %v3789_v12 = vadd.f32 %v4449_v9, %v3749_v8 }
 0x3dd   : > { %v3797_v16 = vmul.f32 %v3789_v12, %v3789_v12  ;;  %v3806_v22 = vand.u32 2147483647, %v3789_v12  ;;  %v3805_v29 = vmax.f32 %v3789_v12, 0.0 }
 0x3df   : > { %v3798_v20 = vsel %vm3796_vm0, %v3797_v16, 0.0  ;;  %v3807_v13 = vsub.f32 0.0, %v3806_v22 }
 0x3e0   : > { %v3800_v21 = vsel %vm3799_vm1, %v3798_v20, 0.0 }
 0x3e1   : > { %3801 = vadd.xlane.f32.xlu0 %v3800_v21  ;;  %v3808_v14 = vmul.f32 1.442695, %v3807_v13 }
 0x3e3   : > { %4616 = vpow2.f32 %v3808_v14 }
 0x3ed   : > { %v4617_v15 = vpop.eup %4616 }
 0x3ee   : > { %v3810_v17 = vadd.f32 1.0, %v4617_v15  ;;  %v3813_v36 = vmul.f32 -0.5, %v4617_v15  ;;  %v3816_v24 = vand.u32 2147483647, %v4617_v15 }
 0x3f0   : > { %4618 = vlog2.f32 %v3810_v17  ;;  %v3814_v23 = vadd.f32 1.0, %v3813_v36  ;;  %vm3817_vm2 = vcmp.lt.f32.partialorder %v3816_v24, 0.0004427343 }
 0x3f2   : > { %v3815_v27 = vmul.f32 %v4617_v15, %v3814_v23 }
 0x3fa   : > { %v4619_v19 = vpop.eup %4618 }
 0x3fb   : > { %v3812_v25 = vmul.f32 0.6931472, %v4619_v19 }
 0x3fd   : > { %v3818_v28 = vsel %vm3817_vm2, %v3815_v27, %v3812_v25 }
 0x3fe   : > { %v3819_v30 = vadd.f32 %v3818_v28, %v3805_v29 }
 0x400   : > { %v3822_v32 = vadd.f32 %v3821_v31, %v3819_v30 }
 0x402   : > { %v3825_v35 = vsel %vm3824_vm3, %v3822_v32, 0.0 }
 0x46e   : > { %v3802_v26 = vpop.xlane.xlu0 %3801 }
 0x46f   : > { %v3803_v60 = vadd.f32 1e-12, %v3802_v26 }
 0x471   : > { %4620 = vrsqrt.f32 %v3803_v60 }
 0x47b   : > { %v4621_v33 = vpop.eup %4620 }
 0x47c   : > { %v3823_v34 = vmul.f32 %v4621_v33, %v3789_v12 }
 0x47e   : > { %v3826_v2 = vsel %vm3796_vm0, %v3823_v34, %v3825_v35 }
 0x47f   : > { %3827 = vst [vmem:[%s5457_s8] sm:$0x3] %v3826_v2 }
 0x480 PF: > { %s19_s29 = sadd.s32 1, %s4628_s29  }
 0x481   : > { %p16_p7 = scmp.ge.s32.totalorder %s19_s29, 6  }
 0x483   :  { %18 = sbr.rel (!%p16_p7) target bundleno = 2 (0x2), region = 89 }

</bundles_post_ra>
